<compile_context>
chip_gen: v5e
topology: v5e:2x2
jax: 0.10.0
libtpu: 0.0.40
codegen_flags: <defaults>
</compile_context>

<pallas_src>
import math

import numpy as np

import jax
import jax.numpy as jnp
from jax.experimental import pallas as pl
from jax.experimental.pallas import tpu as pltpu


# ----------------------------------------------------------------------------
# Constant structural matrices (numpy, no scipy needed)
# ----------------------------------------------------------------------------
def get_block_diagonal_matrix(nb_blocs, bloc):
    if nb_blocs <= 0:
        return np.zeros((0, 0), dtype=np.float32)
    bloc = np.atleast_2d(np.asarray(bloc, dtype=np.float32))
    return np.kron(np.eye(nb_blocs, dtype=np.float32), bloc)


def get_block_diagonal_matrix_b(L):
    b = get_block_diagonal_matrix(L // 2, [[0.0, 1.0], [-1.0, 0.0]])
    if L > 0 and L % 2 != 0:
        b = np.pad(b, ((0, 1), (0, 1)))  # block_diag(b, [0])
    return b.astype(np.float32)


def get_pooling_matrix(L):
    # (L, 2L): block diagonal of [1, 1]
    return get_block_diagonal_matrix(L, [1.0, 1.0])


def get_reordering_matrix(L):
    if L <= 0:
        return np.zeros((0, 0), dtype=np.float32)
    if L == 1:
        return np.array([[1.0]], dtype=np.float32)
    h = L // 2
    r1 = get_block_diagonal_matrix(h, [[1.0], [0.0]])   # (2h, h)
    r2 = get_block_diagonal_matrix(h, [[0.0], [-1.0]])  # (2h, h)
    if L % 2 != 0:
        r = np.concatenate((r1, np.zeros((L - 1, 1), np.float32)), axis=1)
        r = np.concatenate((r, r2), axis=1)
        last = np.zeros((1, L), np.float32)
        last[0, h] = 1.0
        r = np.concatenate((r, last), axis=0)
    else:
        r = np.concatenate((r1, r2), axis=1)
    return r.astype(np.float32)


# ----------------------------------------------------------------------------
# Deterministic parameter init (mirrors the __init__ shapes)
# ----------------------------------------------------------------------------
def xavier_normal(key, shape):
    fan_out, fan_in = shape
    std = math.sqrt(2.0 / (fan_in + fan_out))
    return std * jax.random.normal(key, shape, dtype=jnp.float32)


def orthogonal_init(key, shape):
    # shape = (NB_PX, NB_FACTORS), NB_PX >= NB_FACTORS -> orthonormal columns
    a = jax.random.normal(key, shape, dtype=jnp.float32)
    q, _ = jnp.linalg.qr(a)
    return q.astype(jnp.float32)


def make_rae_params(key, N_MAPPINGS, NB_FACTORS, NB_PX):
    ks = jax.random.split(key, 7)
    params = {
        "w1": xavier_normal(ks[0], (N_MAPPINGS, NB_FACTORS)),
        "w2": xavier_normal(ks[1], (N_MAPPINGS, NB_FACTORS)),
        "x_bias": xavier_normal(ks[2], (1, NB_FACTORS)),
        "y_bias": xavier_normal(ks[3], (1, NB_FACTORS)),
        "m_bias": xavier_normal(ks[4], (1, NB_FACTORS)),
        "b_output": xavier_normal(ks[5], (NB_PX, 1)),
        "u": orthogonal_init(ks[6], (NB_PX, NB_FACTORS)),
    }
    F = NB_FACTORS
    p = get_pooling_matrix(F)                       # (F, 2F)
    b = get_block_diagonal_matrix_b(F)              # (F, F)
    r = get_reordering_matrix(F)                    # (F, F)
    eye = np.eye(F, dtype=np.float32)
    params["p"] = jnp.asarray(p)
    params["b"] = jnp.asarray(b)
    params["e1"] = jnp.asarray(np.concatenate((eye, eye), axis=0))   # (2F, F)
    params["e2"] = jnp.asarray(np.concatenate((eye, b), axis=0))     # (2F, F)
    params["e3"] = jnp.asarray(np.concatenate((r, b @ r), axis=0))   # (2F, F)
    return params


# ----------------------------------------------------------------------------
# Gaussian corruption (std = 0.1) — plain JAX, applied before the kernel.
# (In-kernel hardware-PRNG corruption did not lower in the sandbox environment.)
# ----------------------------------------------------------------------------
def gaussian_noise(x, key, std=0.1):
    return x + std * jax.random.normal(key, x.shape, dtype=x.dtype)


# ----------------------------------------------------------------------------
# Host-side parameter fusion (all products in f32, ONE cast to the MXU dtype)
# ----------------------------------------------------------------------------
def prepare_rae_operands(params, mxu_dtype):
    u = params["u"]            # (P, F)
    b = params["b"]            # (F, F)
    p = params["p"]            # (F, 2F)
    e3 = params["e3"]          # (2F, F)
    w1 = params["w1"]          # (F, F)
    w2 = params["w2"]          # (F, F)

    U = u.astype(mxu_dtype)                                        # (P, F)
    U2 = jnp.concatenate([u, u @ b.T], axis=1).astype(mxu_dtype)   # (P, 2F)
    A = (p.T @ w1).astype(mxu_dtype)                               # (2F, F)
    C = (w2 @ e3.T).astype(mxu_dtype)                              # (F, 2F)
    D = (p.T @ u.T).astype(mxu_dtype)                              # (2F, P)

    xb = params["x_bias"]                                          # (1, F)  f32
    yb2 = jnp.concatenate(
        [params["y_bias"], params["y_bias"] @ b.T], axis=1)        # (1, 2F) f32
    mb = params["m_bias"]                                          # (1, F)  f32
    bout = params["b_output"].T                                    # (1, P)  f32
    return (U, U2, A, C, D, xb, yb2, mb, bout)


# ----------------------------------------------------------------------------
# Pallas kernel: one batch tile of the whole forward pass (5 MXU passes)
# ----------------------------------------------------------------------------
def _rae_kernel(x_ref, y_ref,                      # (TB, P) corrupted row tiles
                u_ref, u2_ref, a_ref, c_ref, d_ref,
                xb_ref, yb2_ref, mb_ref, bout_ref,
                out_ref):
    f32 = jnp.float32
    dot_dt = u_ref.dtype      # bf16 (default) or f32; accumulation is always f32

    cx = x_ref[...].astype(dot_dt)                                    # (TB, P)
    cy = y_ref[...].astype(dot_dt)                                    # (TB, P)

    # f_x = cor_x @ u + x_bias                                        (TB, F)
    f_x = jnp.dot(cx, u_ref[...], preferred_element_type=f32) + xb_ref[...]
    # my  = f_y @ e2.T = [f_y, f_y @ b.T] = cor_y @ U2 + yb2          (TB, 2F)
    my = jnp.dot(cy, u2_ref[...], preferred_element_type=f32) + yb2_ref[...]

    # e1 = [I; I]  =>  mx = concat(f_x, f_x) — single concat, reused twice
    mx = jnp.concatenate([f_x, f_x], axis=-1)                         # (TB, 2F)
    mult = mx * my                                                    # (TB, 2F)

    # m = sigmoid(mult @ (p.T @ w1) + m_bias)                         (TB, F)
    m = jax.nn.sigmoid(
        jnp.dot(mult.astype(dot_dt), a_ref[...], preferred_element_type=f32)
        + mb_ref[...])

    # rf2 = m @ (w2 @ e3.T)                                           (TB, 2F)
    rf2 = jnp.dot(m.astype(dot_dt), c_ref[...], preferred_element_type=f32)
    rec_e3 = rf2 * mx                                                 # (TB, 2F)

    # frame = rec_e3 @ (p.T @ u.T)                                    (TB, P)
    frame = jnp.dot(rec_e3.astype(dot_dt), d_ref[...], preferred_element_type=f32)

    out_ref[...] = jax.nn.sigmoid(frame + bout_ref[...])


def _round_up(v, m):
    return (v + m - 1) // m * m


def rae_forward_pallas(cor_x, cor_y, params, *, block_b=256,
                       mxu_dtype=jnp.bfloat16):
    """cor_x, cor_y: (B, NB_PX) float32 (already Gaussian-corrupted).

    Returns the sigmoid-reconstructed frames (B, NB_PX) float32.
    block_b: batch tile size. On single-TC chips (v5e/v6e) pick it large; on
    v7x keep the grid >= 2 steps so both TensorCores are used.
    """
    # TODO(synk): the torch module's y=None path (re-using the cached self.m /
    # self.m_prim from a previous call) is stateful across forward calls and is
    # not implemented; this kernel implements the full (x, y) training forward.
    B, P = cor_x.shape
    F = params["u"].shape[1]

    tb = min(_round_up(block_b, 8), _round_up(B, 8))
    Bp = _round_up(B, tb)
    if Bp != B:
        cor_x = jnp.pad(cor_x, ((0, Bp - B), (0, 0)))
        cor_y = jnp.pad(cor_y, ((0, Bp - B), (0, 0)))
    nb = Bp // tb

    operands = prepare_rae_operands(params, mxu_dtype)

    row_spec = pl.BlockSpec((tb, P), lambda i: (i, 0))

    def const(a):
        return pl.BlockSpec(a.shape, lambda i: (0, 0))

    in_specs = [row_spec, row_spec] + [const(a) for a in operands]

    # Advisory cost hint for XLA scheduling around the custom call.
    flops = 2 * Bp * (5 * P * F + 4 * F * F)
    param_bytes = sum(int(np.prod(a.shape)) for a in operands) * 4
    cost = pl.CostEstimate(
        flops=int(flops),
        transcendentals=int(Bp * (F + P)),
        bytes_accessed=int(3 * Bp * P * 4 + param_bytes))

    out = pl.pallas_call(
        _rae_kernel,
        out_shape=jax.ShapeDtypeStruct((Bp, P), jnp.float32),
        grid_spec=pltpu.PrefetchScalarGridSpec(
            num_scalar_prefetch=0,
            grid=(nb,),
            in_specs=in_specs,
            out_specs=row_spec),
        compiler_params=pltpu.CompilerParams(
            dimension_semantics=("parallel",)),
        cost_estimate=cost,
    )(cor_x, cor_y, *operands)

    return out[:B]


# ----------------------------------------------------------------------------
# Pure-JAX reference (literal transcription of the torch forward; consumes the
# same corrupted inputs so the comparison is valid and also checks the
# host-side matrix fusions)
# ----------------------------------------------------------------------------
def rae_forward_reference(cor_x, cor_y, params):
    u = params["u"]
    f_x = cor_x @ u + params["x_bias"]
    f_y = cor_y @ u + params["y_bias"]
    mx = params["e1"] @ f_x.T
    my = params["e2"] @ f_y.T
    mult = params["p"] @ (mx * my)
    m = jax.nn.sigmoid(mult.T @ params["w1"] + params["m_bias"])
    rf2 = params["e3"] @ (m @ params["w2"]).T
    rec_e3 = rf2 * mx
    frame = u @ (params["p"] @ rec_e3)
    rec = frame + params["b_output"]
    return jax.nn.sigmoid(rec.T)


# ----------------------------------------------------------------------------
if __name__ == "__main__":
    # NOTE: the PyTorch code only type-checks when N_MAPPINGS == NB_FACTORS.
    B = 128            # batch sized so the grid has 2 steps with block_b=64
    NB_PX = 256        # flattened 16x16 frame
    NB_FACTORS = 128
    N_MAPPINGS = 128

    root = jax.random.PRNGKey(0)
    k_params, k_x, k_y, k_nx, k_ny = jax.random.split(root, 5)

    params = make_rae_params(k_params, N_MAPPINGS, NB_FACTORS, NB_PX)
    x = jax.random.normal(k_x, (B, NB_PX), dtype=jnp.float32)
    y = jax.random.normal(k_y, (B, NB_PX), dtype=jnp.float32)

    # Gaussian corruption (std=0.1, training mode since y is not None)
    cor_x = gaussian_noise(x, k_nx)
    cor_y = gaussian_noise(y, k_ny)

    ref = jax.block_until_ready(rae_forward_reference(cor_x, cor_y, params))

    # 1) f32-MXU run -> tight check against the literal reference
    out32 = jax.block_until_ready(
        rae_forward_pallas(cor_x, cor_y, params, block_b=64,
                           mxu_dtype=jnp.float32))
    assert out32.shape == (B, NB_PX)
    assert np.allclose(np.asarray(out32), np.asarray(ref), rtol=1e-4, atol=1e-4), \
        "f32 Pallas kernel output does not match JAX reference"

    # 2) default fast path: bf16 MXU operands, f32 accumulation / elementwise.
    out16 = jax.block_until_ready(
        rae_forward_pallas(cor_x, cor_y, params, block_b=64))
    max_err = float(np.max(np.abs(np.asarray(out16) - np.asarray(ref))))
    assert max_err < 0.1, f"bf16-MXU path deviates too much from reference: {max_err}"

    print("KERNEL_OK")
</pallas_src>

<mosaic_0001>
module attributes {stable_mosaic.version = 11 : i64} {
  func.func @_rae_kernel(%arg0: i32, %arg1: memref<64x256xf32, #tpu.memory_space<vmem>>, %arg2: memref<64x256xf32, #tpu.memory_space<vmem>>, %arg3: memref<256x128xf32, #tpu.memory_space<vmem>>, %arg4: memref<256x256xf32, #tpu.memory_space<vmem>>, %arg5: memref<256x128xf32, #tpu.memory_space<vmem>>, %arg6: memref<128x256xf32, #tpu.memory_space<vmem>>, %arg7: memref<256x256xf32, #tpu.memory_space<vmem>>, %arg8: memref<1x128xf32, #tpu.memory_space<vmem>>, %arg9: memref<1x256xf32, #tpu.memory_space<vmem>>, %arg10: memref<1x128xf32, #tpu.memory_space<vmem>>, %arg11: memref<1x256xf32, #tpu.memory_space<vmem>>, %arg12: memref<64x256xf32, #tpu.memory_space<vmem>>) attributes {dimension_semantics = [#tpu.dimension_semantics<parallel>], iteration_bounds = array<i64: 2>, scalar_prefetch = 0 : i64, scratch_operands = 0 : i64, tpu.core_type = #tpu.core_type<tc>, window_params = [{transform_indices = @transform_0, window_bounds = array<i64: 64, 256>}, {transform_indices = @transform_1, window_bounds = array<i64: 64, 256>}, {pipeline_mode = #tpu.pipeline_mode<synchronous>, transform_indices = @transform_2, window_bounds = array<i64: 256, 128>}, {pipeline_mode = #tpu.pipeline_mode<synchronous>, transform_indices = @transform_3, window_bounds = array<i64: 256, 256>}, {pipeline_mode = #tpu.pipeline_mode<synchronous>, transform_indices = @transform_4, window_bounds = array<i64: 256, 128>}, {pipeline_mode = #tpu.pipeline_mode<synchronous>, transform_indices = @transform_5, window_bounds = array<i64: 128, 256>}, {pipeline_mode = #tpu.pipeline_mode<synchronous>, transform_indices = @transform_6, window_bounds = array<i64: 256, 256>}, {pipeline_mode = #tpu.pipeline_mode<synchronous>, transform_indices = @transform_7, window_bounds = array<i64: 1, 128>}, {pipeline_mode = #tpu.pipeline_mode<synchronous>, transform_indices = @transform_8, window_bounds = array<i64: 1, 256>}, {pipeline_mode = #tpu.pipeline_mode<synchronous>, transform_indices = @transform_9, window_bounds = array<i64: 1, 128>}, {pipeline_mode = #tpu.pipeline_mode<synchronous>, transform_indices = @transform_10, window_bounds = array<i64: 1, 256>}, {transform_indices = @transform_11, window_bounds = array<i64: 64, 256>}]} {
    %c0 = arith.constant 0 : index
    %c0_0 = arith.constant 0 : index
    %0 = vector.load %arg1[%c0, %c0_0] : memref<64x256xf32, #tpu.memory_space<vmem>>, vector<64x256xf32>
    %c0_1 = arith.constant 0 : index
    %c0_2 = arith.constant 0 : index
    %1 = vector.load %arg2[%c0_1, %c0_2] : memref<64x256xf32, #tpu.memory_space<vmem>>, vector<64x256xf32>
    %c0_3 = arith.constant 0 : index
    %c0_4 = arith.constant 0 : index
    %2 = vector.load %arg3[%c0_3, %c0_4] : memref<256x128xf32, #tpu.memory_space<vmem>>, vector<256x128xf32>
    %cst = arith.constant dense<0.000000e+00> : vector<64x128xf32>
    %3 = tpu.matmul %0, %2, %cst {dimension_numbers = #tpu.dot_dimension_numbers<[1], [0], [0], [1], [0, 0, 1, 1], [], []>} : vector<64x256xf32>, vector<256x128xf32>, vector<64x128xf32> -> vector<64x128xf32>
    %c0_5 = arith.constant 0 : index
    %c0_6 = arith.constant 0 : index
    %4 = vector.load %arg8[%c0_5, %c0_6] : memref<1x128xf32, #tpu.memory_space<vmem>>, vector<1x128xf32>
    %5 = vector.broadcast %4 : vector<1x128xf32> to vector<64x128xf32>
    %6 = arith.addf %3, %5 : vector<64x128xf32>
    %c0_7 = arith.constant 0 : index
    %c0_8 = arith.constant 0 : index
    %7 = vector.load %arg4[%c0_7, %c0_8] : memref<256x256xf32, #tpu.memory_space<vmem>>, vector<256x256xf32>
    %cst_9 = arith.constant dense<0.000000e+00> : vector<64x256xf32>
    %8 = tpu.matmul %1, %7, %cst_9 {dimension_numbers = #tpu.dot_dimension_numbers<[1], [0], [0], [1], [0, 0, 1, 1], [], []>} : vector<64x256xf32>, vector<256x256xf32>, vector<64x256xf32> -> vector<64x256xf32>
    %c0_10 = arith.constant 0 : index
    %c0_11 = arith.constant 0 : index
    %9 = vector.load %arg9[%c0_10, %c0_11] : memref<1x256xf32, #tpu.memory_space<vmem>>, vector<1x256xf32>
    %10 = vector.broadcast %9 : vector<1x256xf32> to vector<64x256xf32>
    %11 = arith.addf %8, %10 : vector<64x256xf32>
    %12 = tpu.concatenate %6, %6 in 1 : vector<64x128xf32>, vector<64x128xf32> -> vector<64x256xf32>
    %13 = arith.mulf %12, %11 : vector<64x256xf32>
    %c0_12 = arith.constant 0 : index
    %c0_13 = arith.constant 0 : index
    %14 = vector.load %arg5[%c0_12, %c0_13] : memref<256x128xf32, #tpu.memory_space<vmem>>, vector<256x128xf32>
    %cst_14 = arith.constant dense<0.000000e+00> : vector<64x128xf32>
    %15 = tpu.matmul %13, %14, %cst_14 {dimension_numbers = #tpu.dot_dimension_numbers<[1], [0], [0], [1], [0, 0, 1, 1], [], []>} : vector<64x256xf32>, vector<256x128xf32>, vector<64x128xf32> -> vector<64x128xf32>
    %c0_15 = arith.constant 0 : index
    %c0_16 = arith.constant 0 : index
    %16 = vector.load %arg10[%c0_15, %c0_16] : memref<1x128xf32, #tpu.memory_space<vmem>>, vector<1x128xf32>
    %17 = vector.broadcast %16 : vector<1x128xf32> to vector<64x128xf32>
    %18 = arith.addf %15, %17 : vector<64x128xf32>
    %19 = arith.negf %18 : vector<64x128xf32>
    %20 = math.exp %19 : vector<64x128xf32>
    %cst_17 = arith.constant 1.000000e+00 : f32
    %21 = vector.broadcast %cst_17 : f32 to vector<64x128xf32>
    %22 = arith.addf %21, %20 : vector<64x128xf32>
    %23 = arith.divf %21, %22 : vector<64x128xf32>
    %c0_18 = arith.constant 0 : index
    %c0_19 = arith.constant 0 : index
    %24 = vector.load %arg6[%c0_18, %c0_19] : memref<128x256xf32, #tpu.memory_space<vmem>>, vector<128x256xf32>
    %cst_20 = arith.constant dense<0.000000e+00> : vector<64x256xf32>
    %25 = tpu.matmul %23, %24, %cst_20 {dimension_numbers = #tpu.dot_dimension_numbers<[1], [0], [0], [1], [0, 0, 1, 1], [], []>} : vector<64x128xf32>, vector<128x256xf32>, vector<64x256xf32> -> vector<64x256xf32>
    %26 = arith.mulf %25, %12 : vector<64x256xf32>
    %c0_21 = arith.constant 0 : index
    %c0_22 = arith.constant 0 : index
    %27 = vector.load %arg7[%c0_21, %c0_22] : memref<256x256xf32, #tpu.memory_space<vmem>>, vector<256x256xf32>
    %cst_23 = arith.constant dense<0.000000e+00> : vector<64x256xf32>
    %28 = tpu.matmul %26, %27, %cst_23 {dimension_numbers = #tpu.dot_dimension_numbers<[1], [0], [0], [1], [0, 0, 1, 1], [], []>} : vector<64x256xf32>, vector<256x256xf32>, vector<64x256xf32> -> vector<64x256xf32>
    %c0_24 = arith.constant 0 : index
    %c0_25 = arith.constant 0 : index
    %29 = vector.load %arg11[%c0_24, %c0_25] : memref<1x256xf32, #tpu.memory_space<vmem>>, vector<1x256xf32>
    %30 = vector.broadcast %29 : vector<1x256xf32> to vector<64x256xf32>
    %31 = arith.addf %28, %30 : vector<64x256xf32>
    %32 = arith.negf %31 : vector<64x256xf32>
    %33 = math.exp %32 : vector<64x256xf32>
    %cst_26 = arith.constant 1.000000e+00 : f32
    %34 = vector.broadcast %cst_26 : f32 to vector<64x256xf32>
    %35 = arith.addf %34, %33 : vector<64x256xf32>
    %36 = arith.divf %34, %35 : vector<64x256xf32>
    %c0_27 = arith.constant 0 : index
    %c0_28 = arith.constant 0 : index
    %37 = vector.load %arg12[%c0_27, %c0_28] : memref<64x256xf32, #tpu.memory_space<vmem>>, vector<64x256xf32>
    tpu.vector_store %arg12[%c0_27, %c0_28], %36 {strides = array<i32>} : memref<64x256xf32, #tpu.memory_space<vmem>>, vector<64x256xf32>,
    return
  }
  func.func @transform_0(%arg0: i32) -> (i32, i32) {
    %c0_i32 = arith.constant 0 : i32
    %c0_i32_0 = arith.constant 0 : i32
    return %arg0, %c0_i32 : i32, i32
  }
  func.func @transform_1(%arg0: i32) -> (i32, i32) {
    %c0_i32 = arith.constant 0 : i32
    %c0_i32_0 = arith.constant 0 : i32
    return %arg0, %c0_i32 : i32, i32
  }
  func.func @transform_2(%arg0: i32) -> (i32, i32) {
    %c0_i32 = arith.constant 0 : i32
    %c0_i32_0 = arith.constant 0 : i32
    %c0_i32_1 = arith.constant 0 : i32
    return %c0_i32, %c0_i32_0 : i32, i32
  }
  func.func @transform_3(%arg0: i32) -> (i32, i32) {
    %c0_i32 = arith.constant 0 : i32
    %c0_i32_0 = arith.constant 0 : i32
    %c0_i32_1 = arith.constant 0 : i32
    return %c0_i32, %c0_i32_0 : i32, i32
  }
  func.func @transform_4(%arg0: i32) -> (i32, i32) {
    %c0_i32 = arith.constant 0 : i32
    %c0_i32_0 = arith.constant 0 : i32
    %c0_i32_1 = arith.constant 0 : i32
    return %c0_i32, %c0_i32_0 : i32, i32
  }
  func.func @transform_5(%arg0: i32) -> (i32, i32) {
    %c0_i32 = arith.constant 0 : i32
    %c0_i32_0 = arith.constant 0 : i32
    %c0_i32_1 = arith.constant 0 : i32
    return %c0_i32, %c0_i32_0 : i32, i32
  }
  func.func @transform_6(%arg0: i32) -> (i32, i32) {
    %c0_i32 = arith.constant 0 : i32
    %c0_i32_0 = arith.constant 0 : i32
    %c0_i32_1 = arith.constant 0 : i32
    return %c0_i32, %c0_i32_0 : i32, i32
  }
  func.func @transform_7(%arg0: i32) -> (i32, i32) {
    %c0_i32 = arith.constant 0 : i32
    %c0_i32_0 = arith.constant 0 : i32
    %c0_i32_1 = arith.constant 0 : i32
    return %c0_i32, %c0_i32_0 : i32, i32
  }
  func.func @transform_8(%arg0: i32) -> (i32, i32) {
    %c0_i32 = arith.constant 0 : i32
    %c0_i32_0 = arith.constant 0 : i32
    %c0_i32_1 = arith.constant 0 : i32
    return %c0_i32, %c0_i32_0 : i32, i32
  }
  func.func @transform_9(%arg0: i32) -> (i32, i32) {
    %c0_i32 = arith.constant 0 : i32
    %c0_i32_0 = arith.constant 0 : i32
    %c0_i32_1 = arith.constant 0 : i32
    return %c0_i32, %c0_i32_0 : i32, i32
  }
  func.func @transform_10(%arg0: i32) -> (i32, i32) {
    %c0_i32 = arith.constant 0 : i32
    %c0_i32_0 = arith.constant 0 : i32
    %c0_i32_1 = arith.constant 0 : i32
    return %c0_i32, %c0_i32_0 : i32, i32
  }
  func.func @transform_11(%arg0: i32) -> (i32, i32) {
    %c0_i32 = arith.constant 0 : i32
    %c0_i32_0 = arith.constant 0 : i32
    return %arg0, %c0_i32 : i32, i32
  }
}

</mosaic_0001>

<bundles_post_ra>
// kernel: tpu_custom_call.1
= control target key start
LH: loop header
LB: loop body
LE: loop exit
PB: predicated region body
PF: predicated region fallthrough
CT: control target
= control target key end

     0   :  { %s3317_s0 = inlined_call_operand.hbm [shape: f32[128,256], index: 0, kind: input, shape index: {}]   ;;  %s3318_s1 = inlined_call_operand.hbm [shape: f32[128,256], index: 1, kind: input, shape index: {}]   ;;  %s3319_s2 = inlined_call_operand.hbm [shape: f32[256,128], index: 2, kind: input, shape index: {}]   ;;  %s3320_s3 = inlined_call_operand.hbm [shape: f32[256,256], index: 3, kind: input, shape index: {}]   ;;  %s3321_s4 = inlined_call_operand.hbm [shape: f32[256,128], index: 4, kind: input, shape index: {}]   ;;  %s3322_s5 = inlined_call_operand.hbm [shape: f32[128,256], index: 5, kind: input, shape index: {}]   ;;  %s3323_s6 = inlined_call_operand.hbm [shape: f32[256,256], index: 6, kind: input, shape index: {}]   ;;  %s3324_s7 = inlined_call_operand.vmem [shape: f32[1,128], index: 7, kind: input, shape index: {}]   ;;  %s3325_s8 = inlined_call_operand.vmem [shape: f32[1,256], index: 8, kind: input, shape index: {}]   ;;  %s3326_s9 = inlined_call_operand.vmem [shape: f32[1,128], index: 9, kind: input, shape index: {}]   ;;  %s3327_s10 = inlined_call_operand.vmem [shape: f32[1,256], index: 10, kind: input, shape index: {}]   ;;  %s3328_s11 = inlined_call_operand.hbm [shape: f32[128,256], index: 11, kind: output, shape index: {}]  }
   0x1   :  { %3336 = sst [smem:[#allocation24_spill]] %s3317_s0 }
   0x2   :  { %3337 = sst [smem:[#allocation25_spill]] %s3319_s2 }
   0x3   :  { %3338 = sst [smem:[#allocation26_spill]] %s3320_s3 }
   0x4   :  { %3339 = sst [smem:[#allocation27_spill]] %s3321_s4 }
   0x5   :  { %3340 = sst [smem:[#allocation28_spill]] %s3322_s5 }
   0x6   :  { %3341 = sst [smem:[#allocation29_spill]] %s3323_s6 }
   0x7   :  { %16 = vsyncpa [#allocation3], 0 }
   0x8   :  { %18 = vsyncpa [#allocation3 + $0x1], 0 }
   0x9   :  { %19 = vsyncpa [#allocation6], 0 }
   0xa   :  { %21 = vsyncpa [#allocation6 + $0x1], 0 }
   0xb   :  { %22 = vsyncpa [#allocation9], 0 }
   0xc   :  { %23 = vsyncpa [#allocation12], 0 }
   0xd   :  { %24 = vsyncpa [#allocation4], 0 }
   0xe   :  { %26 = vsyncpa [#allocation4 + $0x1], 0  ;;  %s2714_s17 = smov 0   ;;  %s2716_s18 = smov 0  }
   0xf   :  { %s2718_s19 = smov 0   ;;  %s2720_s20 = smov 0  }
  0x10 LB: > { %3342 = sst [smem:[#allocation21_spill]] %s2637_s19  ;;  %s2738_s24 = sadd.s32 4294967295, %s2641_s20   ;;  %s2641_s20 = sphi %s2720_s20, %s3373_s20   ;;  %s2637_s19 = sphi %s2718_s19, %s3375_s19   ;;  %s2633_s18 = sphi %s2716_s18, %s3377_s18   ;;  %s2629_s17 = sphi %s2714_s17, %s3376_s17  }
  0x11   : > { %s3343_s2 = sld [smem:[#allocation25_spill]]  ;;  %p2051_p0 = scmp.ge.s32.totalorder %s2641_s20, 1 }
  0x12   : > { %p53_p1 = scmp.eq.s32.totalorder %s2738_s24, 0  ;;  %p304_p2 = scmp.lt.s32.totalorder %s2641_s20, 3 }
  0x13   : > { %s2643_s26 = smov [#allocation7]   ;;  %s3345_s3 = sld [smem:[#allocation26_spill]] }
  0x14   : > { %p2743_p3 = pnand %p2051_p0, %p304_p2  ;;  %s317_s27 = sshll.u32 %s2643_s26, 4  ;;  %s318_s27 = int_to_ptr.vmem [resolvable:$true] %s317_s27 }
  0x15   : > { %s2644_s13 = smov [#allocation8]   ;;  %s2645_s15 = smov 128  }
  0x16   : > { %p2169_p4 = pneg %p2743_p3  ;;  %s331_s14 = sshll.u32 %s2644_s13, 4  ;;  %s332_s14 = int_to_ptr.vmem [resolvable:$true] %s331_s14 }
  0x17   : > { %s315_s23 = sshll.u32 %s3343_s2, 4  ;;  %s2646_s16 = smov 8   ;;  %s316_s23 = int_to_ptr.hbm [resolvable:$true] %s315_s23 }
  0x18   : > { %p2755_p6 = pnand %p2169_p4, %p53_p1  ;;  %s3329_s21 = smov 256  }
  0x19   : > { %s329_s30 = sshll.u32 %s3345_s3, 4  ;;  %s3331_s22 = smov 16   ;;  %s330_s30 = int_to_ptr.hbm [resolvable:$true] %s329_s30 }
  0x1a   : > { %2172 = dma.hbm_to_vmem [thread:$0]  (!%p2755_p6), %s316_s23, 4096, %s318_s27, [#allocation6], %s2645_s15, %s2645_s15, %s2646_s16  }
  0x1b   : > { %2175 = dma.hbm_to_vmem [thread:$0]  (!%p2755_p6), %s330_s30, 8192, %s332_s14, [#allocation9], %s3329_s21, %s3329_s21, %s3331_s22  }
  0x1c   : > { %s3347_s5 = sld [smem:[#allocation28_spill]]  ;;  %s2649_s13 = smov [#allocation11]  }
  0x1d   : > { %s359_s2 = sshll.u32 %s2649_s13, 4  ;;  %s3348_s4 = sld [smem:[#allocation27_spill]]  ;;  %s360_s2 = int_to_ptr.vmem [resolvable:$true] %s359_s2 }
  0x1e   : > { %s2650_s30 = smov [#allocation10]   ;;  %s3349_s6 = sld [smem:[#allocation29_spill]] }
  0x1f   : > { %s345_s14 = sshll.u32 %s2650_s30, 4  ;;  %s2050_s23 = sadd.s32 4294967294, %s2641_s20   ;;  %s346_s14 = int_to_ptr.vmem [resolvable:$true] %s345_s14 }
  0x20   : > { %s2789_s27 = sadd.s32 1, %s2641_s20   ;;  %s39_s30 = sadd.s32 1, %s2637_s19 }
  0x21   : > { %3350 = sst [smem:[#allocation22_spill]] %s2789_s27  ;;  %s36_s26 = ssub.s32 %s2641_s20, %s2789_s27 }
  0x22   : > { %s357_s29 = sshll.u32 %s3347_s5, 4  ;;  %p46_p7 = scmp.ne.s32.totalorder %s2637_s19, %s2633_s18  ;;  %s358_s29 = int_to_ptr.hbm [resolvable:$true] %s357_s29 }
  0x23   : > { %s343_s3 = sshll.u32 %s3348_s4, 4  ;;  %p37_p8 = scmp.eq.s32.totalorder %s36_s26, 0  ;;  %s344_s3 = int_to_ptr.hbm [resolvable:$true] %s343_s3 }
  0x24   : > { %2181 = dma.hbm_to_vmem [thread:$0]  (!%p2755_p6), %s358_s29, 4096, %s360_s2, [#allocation12], %s3329_s21, %s3329_s21, %s3331_s22  }
  0x25   : > { %s371_s13 = sshll.u32 %s3349_s6, 4  ;;  %s2651_s2 = smov [#allocation13]   ;;  %s372_s13 = int_to_ptr.hbm [resolvable:$true] %s371_s13 }
  0x26   : > { %2178 = dma.hbm_to_vmem [thread:$0]  (!%p2755_p6), %s344_s3, 4096, %s346_s14, [#allocation9], %s2645_s15, %s2645_s15, %s2646_s16  }
  0x27   : > { %s373_s29 = sshll.u32 %s2651_s2, 4  ;;  %p47_p9 = scmp.eq.s32.totalorder %s2641_s20, 0  ;;  %s374_s29 = int_to_ptr.vmem [resolvable:$true] %s373_s29 }
  0x28   : > { %2184 = dma.hbm_to_vmem [thread:$0]  (!%p2755_p6), %s372_s13, 8192, %s374_s29, [#allocation12], %s3329_s21, %s3329_s21, %s3331_s22  }
  0x29   : > { %p52_p10 = scmp.ne.s32.totalorder %s2633_s18, %s2629_s17  ;;  %p291_p11 = scmp.eq.s32.totalorder %s2738_s24, 1 }
  0x2a   : > { %s2801_s3 = scalar_select %p37_p8, %s2637_s19, %s39_s30  }
  0x2b   : > { %p2803_p12 = por %p47_p9, %p46_p7  ;;  %p2809_p13 = por %p53_p1, %p52_p10 }
  0x2c   : > { %3351 = sst [smem:[#allocation23_spill]] %s2801_s3  ;;  %p2813_p0 = por %p291_p11, %p46_p7 }
  0x2d   : > { %p297_p2 = scmp.eq.s32.totalorder %s2050_s23, 1  ;;  %p2201_p4 = scmp.lt.s32.totalorder %s2641_s20, 2 }
  0x2e   : > { %s399_s14 = sand.u32 1, %s2637_s19   ;;  %s2106_s2 = sshll.u32 %s2641_s20, 7 }
  0x2f   : > { %p2819_p6 = por %p297_p2, %p52_p10  ;;  %s2058_s13 = sshll.u32 %s399_s14, 7 }
  0x30   : > { %s3356_s0 = sld [smem:[#allocation24_spill]]  ;;  %s403_s22 = scalar_lea.vmem [#allocation2], %s2058_s13 }
  0x31   : > { %s412_s4 = sshll.u32 %s403_s22, 4  ;;  %p2829_p7 = pnand %p2201_p4, %p2803_p12  ;;  %s413_s4 = int_to_ptr.vmem [resolvable:$true] %s412_s4 }
  0x32   : > { %s432_s3 = scalar_lea.hbm %s3318_s1, %s2106_s2  ;;  %s426_s19 = scalar_lea.vmem [#allocation5], %s2058_s13 }
  0x33   : > { %s2836_s27 = sshll.u32 %s426_s19, 4  ;;  %s433_s29 = sshll.u32 %s432_s3, 4  ;;  %s434_s29 = int_to_ptr.hbm [resolvable:$true] %s433_s29  ;;  %s436_s27 = int_to_ptr.vmem [resolvable:$true] %s2836_s27 }
  0x34   : > { %s400_s30 = scalar_lea.sflag [#allocation3], %s399_s14  ;;  %p2503_p9 = pneg %p2829_p7 }
  0x36   : > { %s409_s26 = scalar_lea.hbm %s3356_s0, %s2106_s2  ;;  %s2506_s6 = scalar_lea.hbm %s3356_s0, 256 }
  0x37   : > { %s410_s21 = sshll.u32 %s409_s26, 4  ;;  %s411_s21 = int_to_ptr.hbm [resolvable:$true] %s410_s21 }
  0x38   : > { %s2499_s26 = sshra.s32 %s411_s21, 4  ;;  %s2500_s26 = int_to_ptr.hbm [resolvable:$true] %s2499_s26 }
  0x39   : > { %s2501_s22 = scalar_lea.hbm %s2500_s26, 128  ;;  %p2507_p12 = scmp.lt.s32.totalorder %s2500_s26, %s3356_s0 }
  0x3a   : > { %p2502_p8 = scmp.ne.s32.totalorder %s2500_s26, %s2501_s22  ;;  %p2508_p2 = scmp.lt.s32.totalorder %s2506_s6, %s2501_s22 }
  0x3c   : > { %p2504_p10 = pnand %p2503_p9, %p2502_p8  ;;  %p2509_p4 = por %p2508_p2, %p2507_p12 }
  0x3e   : > { %p2505_p11 = pneg %p2504_p10 }
  0x40   : > { %p2510_p5 = pnand %p2509_p4, %p2505_p11 }
  0x42   : > { %2513 = shalt.err (!%p2510_p5)
}
  0x43   : > { %s3358_s19 = smov 16   ;;  %s3359_s3 = smov 256  }
  0x44   : > { %2188 = dma.hbm_to_vmem [thread:$0]  (!%p2829_p7), %s411_s21, 2048, %s413_s4, %s400_s30, %s3359_s3, %s3359_s3, %s3358_s19  }
  0x45   : > { %s422_s14 = sand.u32 1, %s2641_s20   ;;  %s2529_s5 = sshra.s32 %s434_s29, 4  ;;  %s2530_s5 = int_to_ptr.hbm [resolvable:$true] %s2529_s5 }
  0x46   : > { %s423_s12 = scalar_lea.sflag [#allocation6], %s422_s14  ;;  %s2531_s26 = scalar_lea.hbm %s2530_s5, 128 }
  0x47   : > { %p2532_p8 = scmp.ne.s32.totalorder %s2530_s5, %s2531_s26  ;;  %s2536_s2 = scalar_lea.hbm %s3318_s1, 256 }
  0x48   : > { %p2537_p11 = scmp.lt.s32.totalorder %s2530_s5, %s3318_s1  ;;  %p2538_p12 = scmp.lt.s32.totalorder %s2536_s2, %s2531_s26 }
  0x49   : > { %p2534_p5 = pnand %p2532_p8, %p2503_p9 }
  0x4a   : > { %p2539_p2 = por %p2538_p12, %p2537_p11 }
  0x4b   : > { %p2535_p10 = pneg %p2534_p5 }
  0x4d   : > { %p2540_p4 = pnand %p2539_p2, %p2535_p10 }
  0x4f   : > { %2543 = shalt.err (!%p2540_p4)
}
  0x50   : > { %2191 = dma.hbm_to_vmem [thread:$0]  (!%p2829_p7), %s434_s29, 2048, %s436_s27, %s423_s12, %s3359_s3, %s3359_s3, %s3358_s19  }
  0x51   : > { %447 = sbr.rel (%p2743_p3) target bundleno = 826 (0x33a), region = 64  ;;  %s2873_s4 = sand.u32 (!%p2743_p3), 1, %s2633_s18  }
  0x52   : > { %s2876_s0 = sshll.u32 (!%p2743_p3), %s2873_s4, 7  ;;  %s450_s21 = scalar_lea.sflag (!%p2743_p3), [#allocation3], %s2873_s4 }
  0x53   : > { %s2880_s30 = scalar_lea.vmem (!%p2743_p3), [#allocation2], %s2876_s0 }
  0x56   : > { %2604 = dma.done.wait (%p2809_p13), %s450_s21, 2048  }
  0x57   : > { %2606 = vsyncadd (%p2809_p13), %s450_s21, 4294965248  ;;  %s459_s25 = sand.u32 1, %s2738_s24   ;;  %s2888_s23 = scalar_lea.vmem [#allocation5], %s2876_s0 }
  0x58   : > { %s460_s27 = scalar_lea.sflag [#allocation6], %s459_s25 }
  0x59   : > { %2608 = dma.done.wait (%p2809_p13), %s460_s27, 2048  }
  0x5a   : > { %2610 = vsyncadd (%p2809_p13), %s460_s27, 4294965248 }
  0x5b   : > { %2612 = dma.done.wait (%p53_p1), [#allocation6], 4096  }
  0x5c   : > { %2614 = vsyncadd (%p53_p1), [#allocation6], 4294963200 }
  0x5d   : > { %2616 = dma.done.wait (%p53_p1), [#allocation9], 12288  }
  0x5e   : > { %2618 = vsyncadd (%p53_p1), [#allocation9], 4294955008 }
  0x5f   : > { %2620 = dma.done.wait (%p53_p1), [#allocation12], 12288  }
  0x60   : > { %2622 = vsyncadd (%p53_p1), [#allocation12], 4294955008  ;;  %v583_v0 = vld [vmem:[#allocation7 + $0x78] sm:$0xff]  ;;  %v582_v1 = vld [vmem:[#allocation7 + $0x70] sm:$0xff]  ;;  %s3135_s22 = scalar_lea.vmem [#allocation14], %s2876_s0  ;;  %s2110_s6 = sshll.u32 %s2738_s24, 7 }
  0x61   : > { %v599_v2 = vld [vmem:[#allocation7 + $0xf8] sm:$0xff]  ;;  %604 = vmatpush.msra.mxu0 %v583_v0  ;;  %2111 = vmatpush.msra.mxu2 %v583_v0  ;;  %v598_v3 = vld [vmem:[#allocation7 + $0xf0] sm:$0xff]  ;;  %v581_v4 = vld [vmem:[#allocation7 + $0x68] sm:$0xff]  ;;  %s1903_s0 = scalar_lea.hbm %s3328_s11, %s2110_s6  ;;  %s1904_s24 = sshll.u32 %s3135_s22, 4  ;;  %s1905_s24 = int_to_ptr.vmem [resolvable:$true] %s1904_s24 }
  0x62   : > { %645 = vmatpush.msra.mxu1 %v599_v2  ;;  %2127 = vmatpush.msra.mxu3 %v599_v2  ;;  %v597_v5 = vld [vmem:[#allocation7 + $0xe8] sm:$0xff]  ;;  %v580_v6 = vld [vmem:[#allocation7 + $0x60] sm:$0xff]  ;;  %v579_v8 = vld [vmem:[#allocation7 + $0x58] sm:$0xff]  ;;  %s1906_s21 = sshll.u32 %s1903_s0, 4  ;;  %s2579_s29 = scalar_lea.hbm %s3328_s11, 256  ;;  %s1907_s21 = int_to_ptr.hbm [resolvable:$true] %s1906_s21 }
  0x63   : > { %605 = vmatpush.msra.mxu0 %v582_v1  ;;  %2112 = vmatpush.msra.mxu2 %v582_v1  ;;  %v596_v7 = vld [vmem:[#allocation7 + $0xe0] sm:$0xff]  ;;  %v595_v9 = vld [vmem:[#allocation7 + $0xd8] sm:$0xff]  ;;  %v578_v10 = vld [vmem:[#allocation7 + $0x50] sm:$0xff]  ;;  %s2573_s25 = sshra.s32 %s1907_s21, 4  ;;  %s2574_s25 = int_to_ptr.hbm [resolvable:$true] %s2573_s25 }
  0x64   : > { %646 = vmatpush.msra.mxu1 %v598_v3  ;;  %2128 = vmatpush.msra.mxu3 %v598_v3  ;;  %v594_v11 = vld [vmem:[#allocation7 + $0xd0] sm:$0xff]  ;;  %v577_v12 = vld [vmem:[#allocation7 + $0x48] sm:$0xff]  ;;  %v576_v14 = vld [vmem:[#allocation7 + $0x40] sm:$0xff]  ;;  %s2575_s27 = scalar_lea.hbm %s2574_s25, 128  ;;  %p2580_p7 = scmp.lt.s32.totalorder %s2574_s25, %s3328_s11 }
  0x65   : > { %606 = vmatpush.msra.mxu0 %v581_v4  ;;  %2113 = vmatpush.msra.mxu2 %v581_v4  ;;  %v593_v13 = vld [vmem:[#allocation7 + $0xc8] sm:$0xff]  ;;  %v592_v15 = vld [vmem:[#allocation7 + $0xc0] sm:$0xff]  ;;  %v575_v16 = vld [vmem:[#allocation7 + $0x38] sm:$0xff]  ;;  %p2576_p1 = scmp.ne.s32.totalorder %s2574_s25, %s2575_s27  ;;  %p2581_p9 = scmp.lt.s32.totalorder %s2579_s29, %s2575_s27 }
  0x66   : > { %647 = vmatpush.msra.mxu1 %v597_v5  ;;  %2129 = vmatpush.msra.mxu3 %v597_v5  ;;  %v591_v17 = vld [vmem:[#allocation7 + $0xb8] sm:$0xff]  ;;  %v574_v18 = vld [vmem:[#allocation7 + $0x30] sm:$0xff]  ;;  %v573_v20 = vld [vmem:[#allocation7 + $0x28] sm:$0xff] }
  0x67   : > { %607 = vmatpush.msra.mxu0 %v580_v6  ;;  %2114 = vmatpush.msra.mxu2 %v580_v6  ;;  %v590_v19 = vld [vmem:[#allocation7 + $0xb0] sm:$0xff]  ;;  %v589_v21 = vld [vmem:[#allocation7 + $0xa8] sm:$0xff]  ;;  %v572_v22 = vld [vmem:[#allocation7 + $0x20] sm:$0xff]  ;;  %p2577_p3 = pnand %p2576_p1, %p2813_p0  ;;  %p2582_p8 = por %p2581_p9, %p2580_p7 }
  0x68   : > { %648 = vmatpush.msra.mxu1 %v596_v7  ;;  %2130 = vmatpush.msra.mxu3 %v596_v7  ;;  %v588_v23 = vld [vmem:[#allocation7 + $0xa0] sm:$0xff]  ;;  %v571_v24 = vld [vmem:[#allocation7 + $0x18] sm:$0xff]  ;;  %v570_v26 = vld [vmem:[#allocation7 + $0x10] sm:$0xff] }
  0x69   : > { %608 = vmatpush.msra.mxu0 %v579_v8  ;;  %2115 = vmatpush.msra.mxu2 %v579_v8  ;;  %v587_v25 = vld [vmem:[#allocation7 + $0x98] sm:$0xff]  ;;  %v586_v27 = vld [vmem:[#allocation7 + $0x90] sm:$0xff]  ;;  %v569_v28 = vld [vmem:[#allocation7 + $0x8] sm:$0xff]  ;;  %p2578_p13 = pneg %p2577_p3 }
  0x6a   : > { %649 = vmatpush.msra.mxu1 %v595_v9  ;;  %2131 = vmatpush.msra.mxu3 %v595_v9  ;;  %v585_v29 = vld [vmem:[#allocation7 + $0x88] sm:$0xff]  ;;  %v568_v30 = vld [vmem:[#allocation7] sm:$0xff]  ;;  %v716_v33 = vld [vmem:[#allocation8 + $0xf0] sm:$0xff] }
  0x6b   : > { %609 = vmatpush.msra.mxu0 %v578_v10  ;;  %2116 = vmatpush.msra.mxu2 %v578_v10  ;;  %v536_v31 = vld [vmem:[%s2880_s30] sm:$0xff]  ;;  %v717_v35 = vld [vmem:[#allocation8 + $0xf8] sm:$0xff]  ;;  %v537_v36 = vld [vmem:[%s2880_s30 + $0x8] sm:$0xff]  ;;  %p2583_p5 = pnand %p2582_p8, %p2578_p13 }
  0x6c   : > { %650 = vmatpush.msra.mxu1 %v594_v11  ;;  %2132 = vmatpush.msra.mxu3 %v594_v11  ;;  %v544_v32 = vld [vmem:[%s2880_s30 + $0x40] sm:$0xff]  ;;  %v545_v37 = vld [vmem:[%s2880_s30 + $0x48] sm:$0xff]  ;;  %v748_v39 = vld [vmem:[#allocation8 + $0x1f0] sm:$0xff] }
  0x6d   : > { %610 = vmatpush.msra.mxu0 %v577_v12  ;;  %2117 = vmatpush.msra.mxu2 %v577_v12  ;;  %v584_v34 = vld [vmem:[#allocation7 + $0x80] sm:$0xff]  ;;  %v715_v40 = vld [vmem:[#allocation8 + $0xe8] sm:$0xff]  ;;  %v749_v41 = vld [vmem:[#allocation8 + $0x1f8] sm:$0xff] }
  0x6e   : > { %651 = vmatpush.msra.mxu1 %v593_v13  ;;  %2133 = vmatpush.msra.mxu3 %v593_v13  ;;  %v714_v38 = vld [vmem:[#allocation8 + $0xe0] sm:$0xff]  ;;  %v712_v42 = vld [vmem:[#allocation8 + $0xd0] sm:$0xff]  ;;  %v713_v44 = vld [vmem:[#allocation8 + $0xd8] sm:$0xff] }
  0x6f   : > { %611 = vmatpush.msra.mxu0 %v576_v14  ;;  %2118 = vmatpush.msra.mxu2 %v576_v14  ;;  %v746_v43 = vld [vmem:[#allocation8 + $0x1e0] sm:$0xff]  ;;  %v747_v45 = vld [vmem:[#allocation8 + $0x1e8] sm:$0xff]  ;;  %v744_v47 = vld [vmem:[#allocation8 + $0x1d0] sm:$0xff] }
  0x70   : > { %652 = vmatpush.msra.mxu1 %v592_v15  ;;  %2134 = vmatpush.msra.mxu3 %v592_v15  ;;  %v710_v46 = vld [vmem:[#allocation8 + $0xc0] sm:$0xff]  ;;  %v711_v48 = vld [vmem:[#allocation8 + $0xc8] sm:$0xff]  ;;  %v745_v49 = vld [vmem:[#allocation8 + $0x1d8] sm:$0xff] }
  0x71   : > { %612 = vmatpush.msra.mxu0 %v575_v16  ;;  %2119 = vmatpush.msra.mxu2 %v575_v16  ;;  %v538_v50 = vld [vmem:[%s2880_s30 + $0x10] sm:$0xff]  ;;  %v742_v53 = vld [vmem:[#allocation8 + $0x1c0] sm:$0xff]  ;;  %v709_v54 = vld [vmem:[#allocation8 + $0xb8] sm:$0xff] }
  0x72   : > { %653 = vmatpush.msra.mxu1 %v591_v17  ;;  %2135 = vmatpush.msra.mxu3 %v591_v17  ;;  %v546_v51 = vld [vmem:[%s2880_s30 + $0x50] sm:$0xff]  ;;  %v743_v55 = vld [vmem:[#allocation8 + $0x1c8] sm:$0xff]  ;;  %v539_v56 = vld [vmem:[%s2880_s30 + $0x18] sm:$0xff] }
  0x73   : > { %613 = vmatpush.msra.mxu0 %v574_v18  ;;  %2120 = vmatpush.msra.mxu2 %v574_v18  ;;  %v708_v52 = vld [vmem:[#allocation8 + $0xb0] sm:$0xff]  ;;  %v547_v57 = vld [vmem:[%s2880_s30 + $0x58] sm:$0xff]  ;;  %v706_v58 = vld [vmem:[#allocation8 + $0xa0] sm:$0xff] }
  0x74   : > { %654 = vmatpush.msra.mxu1 %v590_v19  ;;  %2136 = vmatpush.msra.mxu3 %v590_v19  ;;  %v740_v59 = vld [vmem:[#allocation8 + $0x1b0] sm:$0xff]  ;;  %v707_v60 = vld [vmem:[#allocation8 + $0xa8] sm:$0xff]  ;;  %v741_v61 = vld [vmem:[#allocation8 + $0x1b8] sm:$0xff] }
  0x75   : > { %614 = vmatpush.msra.mxu0 %v573_v20  ;;  %2121 = vmatpush.msra.mxu2 %v573_v20  ;;  %v704_v62 = vld [vmem:[#allocation8 + $0x90] sm:$0xff]  ;;  %v738_v63 = vld [vmem:[#allocation8 + $0x1a0] sm:$0xff]  ;;  %v705_v0 = vld [vmem:[#allocation8 + $0x98] sm:$0xff] }
  0x76   : > { %655 = vmatpush.msra.mxu1 %v589_v21  ;;  %2137 = vmatpush.msra.mxu3 %v589_v21  ;;  %v739_v1 = vld [vmem:[#allocation8 + $0x1a8] sm:$0xff]  ;;  %v702_v2 = vld [vmem:[#allocation8 + $0x80] sm:$0xff]  ;;  %v736_v3 = vld [vmem:[#allocation8 + $0x190] sm:$0xff] }
  0x77   : > { %615 = vmatpush.msra.mxu0 %v572_v22  ;;  %2122 = vmatpush.msra.mxu2 %v572_v22  ;;  %v703_v4 = vld [vmem:[#allocation8 + $0x88] sm:$0xff]  ;;  %v737_v5 = vld [vmem:[#allocation8 + $0x198] sm:$0xff]  ;;  %v540_v6 = vld [vmem:[%s2880_s30 + $0x20] sm:$0xff] }
  0x78   : > { %656 = vmatpush.msra.mxu1 %v588_v23  ;;  %2138 = vmatpush.msra.mxu3 %v588_v23  ;;  %v548_v7 = vld [vmem:[%s2880_s30 + $0x60] sm:$0xff]  ;;  %v700_v8 = vld [vmem:[#allocation8 + $0x70] sm:$0xff]  ;;  %v701_v10 = vld [vmem:[#allocation8 + $0x78] sm:$0xff] }
  0x79   : > { %616 = vmatpush.msra.mxu0 %v571_v24  ;;  %2123 = vmatpush.msra.mxu2 %v571_v24  ;;  %v734_v9 = vld [vmem:[#allocation8 + $0x180] sm:$0xff]  ;;  %v735_v11 = vld [vmem:[#allocation8 + $0x188] sm:$0xff]  ;;  %v732_v15 = vld [vmem:[#allocation8 + $0x170] sm:$0xff] }
  0x7a   : > { %657 = vmatpush.msra.mxu1 %v587_v25  ;;  %2139 = vmatpush.msra.mxu3 %v587_v25  ;;  %v541_v12 = vld [vmem:[%s2880_s30 + $0x28] sm:$0xff]  ;;  %v698_v14 = vld [vmem:[#allocation8 + $0x60] sm:$0xff]  ;;  %v733_v17 = vld [vmem:[#allocation8 + $0x178] sm:$0xff] }
  0x7b   : > { %617 = vmatpush.msra.mxu0 %v570_v26  ;;  %2124 = vmatpush.msra.mxu2 %v570_v26  ;;  %v549_v13 = vld [vmem:[%s2880_s30 + $0x68] sm:$0xff]  ;;  %v696_v18 = vld [vmem:[#allocation8 + $0x50] sm:$0xff]  ;;  %v730_v19 = vld [vmem:[#allocation8 + $0x160] sm:$0xff] }
  0x7c   : > { %658 = vmatpush.msra.mxu1 %v586_v27  ;;  %2140 = vmatpush.msra.mxu3 %v586_v27  ;;  %v699_v16 = vld [vmem:[#allocation8 + $0x68] sm:$0xff]  ;;  %v697_v20 = vld [vmem:[#allocation8 + $0x58] sm:$0xff]  ;;  %v694_v22 = vld [vmem:[#allocation8 + $0x40] sm:$0xff] }
  0x7d   : > { %618 = vmatpush.msra.mxu0 %v569_v28  ;;  %2125 = vmatpush.msra.mxu2 %v569_v28  ;;  %v731_v21 = vld [vmem:[#allocation8 + $0x168] sm:$0xff]  ;;  %v728_v23 = vld [vmem:[#allocation8 + $0x150] sm:$0xff]  ;;  %v729_v25 = vld [vmem:[#allocation8 + $0x158] sm:$0xff] }
  0x7e   : > { %659 = vmatpush.msra.mxu1 %v585_v29  ;;  %2141 = vmatpush.msra.mxu3 %v585_v29  ;;  %v695_v24 = vld [vmem:[#allocation8 + $0x48] sm:$0xff]  ;;  %v542_v26 = vld [vmem:[%s2880_s30 + $0x30] sm:$0xff]  ;;  %v726_v29 = vld [vmem:[#allocation8 + $0x140] sm:$0xff] }
  0x7f   : > { %619 = vmatpush.msra.mxu0 %v568_v30  ;;  %2126 = vmatpush.msra.mxu2 %v568_v30  ;;  %v550_v27 = vld [vmem:[%s2880_s30 + $0x70] sm:$0xff]  ;;  %v693_v30 = vld [vmem:[#allocation8 + $0x38] sm:$0xff] }
  0x80   : > { %620 = vmatmul.f32.vlgmr.msra.gmra.mxu0 %v536_v31  ;;  %632 = vmatmul.f32.vlgmr.msra.gmra.mxu2 %v544_v32  ;;  %v692_v28 = vld [vmem:[#allocation8 + $0x30] sm:$0xff]  ;;  %v727_v31 = vld [vmem:[#allocation8 + $0x148] sm:$0xff]  ;;  %v543_v32 = vld [vmem:[%s2880_s30 + $0x38] sm:$0xff] }
  0x81   : > { %756 = vmatpush.msrb.mxu2 %v716_v33  ;;  %660 = vmatpush.msra.mxu1 %v584_v34  ;;  %v551_v33 = vld [vmem:[%s2880_s30 + $0x78] sm:$0xff]  ;;  %s1891_s30 = scalar_lea.sflag [#allocation4], %s2873_s4 }
  0x82   : > { %2142 = vmatpush.msra.mxu3 %v584_v34  ;;  %838 = vmatpush.msrb.mxu0 %v717_v35  ;;  %v690_v34 = vld [vmem:[#allocation8 + $0x20] sm:$0xff]  ;;  %v724_v35 = vld [vmem:[#allocation8 + $0x130] sm:$0xff] }
  0x83   : > { %661 = vmatmul.f32.vlgmr.msra.gmra.mxu1 %v537_v36  ;;  %673 = vmatmul.f32.vlgmr.msra.gmra.mxu3 %v545_v37  ;;  %v691_v36 = vld [vmem:[#allocation8 + $0x28] sm:$0xff]  ;;  %v725_v37 = vld [vmem:[#allocation8 + $0x138] sm:$0xff] }
  0x84   : > { %757 = vmatpush.msrb.mxu2 %v714_v38  ;;  %797 = vmatpush.msrb.mxu3 %v748_v39  ;;  %v688_v38 = vld [vmem:[#allocation8 + $0x10] sm:$0xff]  ;;  %v722_v39 = vld [vmem:[#allocation8 + $0x120] sm:$0xff] }
  0x85   : > { %839 = vmatpush.msrb.mxu0 %v715_v40  ;;  %879 = vmatpush.msrb.mxu1 %v749_v41  ;;  %v689_v40 = vld [vmem:[#allocation8 + $0x18] sm:$0xff]  ;;  %v723_v41 = vld [vmem:[#allocation8 + $0x128] sm:$0xff] }
  0x86   : > { %758 = vmatpush.msrb.mxu2 %v712_v42  ;;  %798 = vmatpush.msrb.mxu3 %v746_v43  ;;  %v686_v42 = vld [vmem:[#allocation8] sm:$0xff]  ;;  %v720_v43 = vld [vmem:[#allocation8 + $0x110] sm:$0xff] }
  0x87   : > { %840 = vmatpush.msrb.mxu0 %v713_v44  ;;  %880 = vmatpush.msrb.mxu1 %v747_v45  ;;  %v687_v44 = vld [vmem:[#allocation8 + $0x8] sm:$0xff]  ;;  %v721_v45 = vld [vmem:[#allocation8 + $0x118] sm:$0xff] }
  0x88   : > { %759 = vmatpush.msrb.mxu2 %v710_v46  ;;  %799 = vmatpush.msrb.mxu3 %v744_v47  ;;  %v552_v46 = vld [vmem:[%s2888_s23] sm:$0xff] }
  0x89   : > { %841 = vmatpush.msrb.mxu0 %v711_v48  ;;  %881 = vmatpush.msrb.mxu1 %v745_v49  ;;  %v718_v47 = vld [vmem:[#allocation8 + $0x100] sm:$0xff]  ;;  %v719_v48 = vld [vmem:[#allocation8 + $0x108] sm:$0xff] }
  0x8a   : > { %623 = vmatmul.f32.gmra.mxu0 %v538_v50  ;;  %635 = vmatmul.f32.gmra.mxu2 %v546_v51  ;;  %v553_v49 = vld [vmem:[%s2888_s23 + $0x8] sm:$0xff]  ;;  %v554_v50 = vld [vmem:[%s2888_s23 + $0x10] sm:$0xff]  ;;  %v555_v51 = vld [vmem:[%s2888_s23 + $0x18] sm:$0xff] }
  0x8b   : > { %760 = vmatpush.msrb.mxu2 %v708_v52  ;;  %800 = vmatpush.msrb.mxu3 %v742_v53  ;;  %v556_v52 = vld [vmem:[%s2888_s23 + $0x20] sm:$0xff]  ;;  %v557_v53 = vld [vmem:[%s2888_s23 + $0x28] sm:$0xff] }
  0x8c   : > { %842 = vmatpush.msrb.mxu0 %v709_v54  ;;  %882 = vmatpush.msrb.mxu1 %v743_v55  ;;  %v558_v54 = vld [vmem:[%s2888_s23 + $0x30] sm:$0xff]  ;;  %v559_v55 = vld [vmem:[%s2888_s23 + $0x38] sm:$0xff] }
  0x8d   : > { %664 = vmatmul.f32.gmra.mxu1 %v539_v56  ;;  %676 = vmatmul.f32.gmra.mxu3 %v547_v57  ;;  %v951_v56 = vld [vmem:[#allocation10 + $0x78] sm:$0xff] }
  0x8e   : > { %761 = vmatpush.msrb.mxu2 %v706_v58  ;;  %801 = vmatpush.msrb.mxu3 %v740_v59  ;;  %v967_v57 = vld [vmem:[#allocation10 + $0xf8] sm:$0xff]  ;;  %v950_v58 = vld [vmem:[#allocation10 + $0x70] sm:$0xff] }
  0x8f   : > { %843 = vmatpush.msrb.mxu0 %v707_v60  ;;  %883 = vmatpush.msrb.mxu1 %v741_v61  ;;  %v966_v59 = vld [vmem:[#allocation10 + $0xf0] sm:$0xff]  ;;  %v949_v60 = vld [vmem:[#allocation10 + $0x68] sm:$0xff] }
  0x90   : > { %762 = vmatpush.msrb.mxu2 %v704_v62  ;;  %802 = vmatpush.msrb.mxu3 %v738_v63  ;;  %v965_v61 = vld [vmem:[#allocation10 + $0xe8] sm:$0xff]  ;;  %v560_v62 = vld [vmem:[%s2888_s23 + $0x40] sm:$0xff] }
  0x91   : > { %844 = vmatpush.msrb.mxu0 %v705_v0  ;;  %884 = vmatpush.msrb.mxu1 %v739_v1  ;;  %v948_v63 = vld [vmem:[#allocation10 + $0x60] sm:$0xff]  ;;  %v561_v0 = vld [vmem:[%s2888_s23 + $0x48] sm:$0xff] }
  0x92   : > { %763 = vmatpush.msrb.mxu2 %v702_v2  ;;  %803 = vmatpush.msrb.mxu3 %v736_v3  ;;  %v964_v1 = vld [vmem:[#allocation10 + $0xe0] sm:$0xff]  ;;  %v947_v2 = vld [vmem:[#allocation10 + $0x58] sm:$0xff] }
  0x93   : > { %845 = vmatpush.msrb.mxu0 %v703_v4  ;;  %885 = vmatpush.msrb.mxu1 %v737_v5  ;;  %v963_v3 = vld [vmem:[#allocation10 + $0xd8] sm:$0xff]  ;;  %v562_v4 = vld [vmem:[%s2888_s23 + $0x50] sm:$0xff] }
  0x94   : > { %626 = vmatmul.f32.gmra.mxu0 %v540_v6  ;;  %638 = vmatmul.f32.gmra.mxu2 %v548_v7  ;;  %v563_v5 = vld [vmem:[%s2888_s23 + $0x58] sm:$0xff]  ;;  %v564_v6 = vld [vmem:[%s2888_s23 + $0x60] sm:$0xff]  ;;  %v565_v7 = vld [vmem:[%s2888_s23 + $0x68] sm:$0xff] }
  0x95   : > { %764 = vmatpush.msrb.mxu2 %v700_v8  ;;  %804 = vmatpush.msrb.mxu3 %v734_v9  ;;  %v566_v8 = vld [vmem:[%s2888_s23 + $0x70] sm:$0xff] }
  0x96   : > { %846 = vmatpush.msrb.mxu0 %v701_v10  ;;  %886 = vmatpush.msrb.mxu1 %v735_v11  ;;  %v946_v9 = vld [vmem:[#allocation10 + $0x50] sm:$0xff]  ;;  %v567_v10 = vld [vmem:[%s2888_s23 + $0x78] sm:$0xff] }
  0x97   : > { %667 = vmatmul.f32.gmra.mxu1 %v541_v12  ;;  %679 = vmatmul.f32.gmra.mxu3 %v549_v13  ;;  %v962_v11 = vld [vmem:[#allocation10 + $0xd0] sm:$0xff]  ;;  %v945_v12 = vld [vmem:[#allocation10 + $0x48] sm:$0xff] }
  0x98   : > { %765 = vmatpush.msrb.mxu2 %v698_v14  ;;  %805 = vmatpush.msrb.mxu3 %v732_v15  ;;  %v961_v13 = vld [vmem:[#allocation10 + $0xc8] sm:$0xff]  ;;  %v944_v14 = vld [vmem:[#allocation10 + $0x40] sm:$0xff] }
  0x99   : > { %847 = vmatpush.msrb.mxu0 %v699_v16  ;;  %887 = vmatpush.msrb.mxu1 %v733_v17  ;;  %v960_v15 = vld [vmem:[#allocation10 + $0xc0] sm:$0xff]  ;;  %v943_v16 = vld [vmem:[#allocation10 + $0x38] sm:$0xff] }
  0x9a   : > { %766 = vmatpush.msrb.mxu2 %v696_v18  ;;  %806 = vmatpush.msrb.mxu3 %v730_v19  ;;  %v959_v17 = vld [vmem:[#allocation10 + $0xb8] sm:$0xff]  ;;  %v942_v18 = vld [vmem:[#allocation10 + $0x30] sm:$0xff] }
  0x9b   : > { %848 = vmatpush.msrb.mxu0 %v697_v20  ;;  %888 = vmatpush.msrb.mxu1 %v731_v21  ;;  %v958_v19 = vld [vmem:[#allocation10 + $0xb0] sm:$0xff]  ;;  %v941_v20 = vld [vmem:[#allocation10 + $0x28] sm:$0xff] }
  0x9c   : > { %767 = vmatpush.msrb.mxu2 %v694_v22  ;;  %807 = vmatpush.msrb.mxu3 %v728_v23  ;;  %v957_v21 = vld [vmem:[#allocation10 + $0xa8] sm:$0xff]  ;;  %v940_v22 = vld [vmem:[#allocation10 + $0x20] sm:$0xff] }
  0x9d   : > { %849 = vmatpush.msrb.mxu0 %v695_v24  ;;  %889 = vmatpush.msrb.mxu1 %v729_v25  ;;  %v956_v24 = vld [vmem:[#allocation10 + $0xa0] sm:$0xff]  ;;  %v939_v25 = vld [vmem:[#allocation10 + $0x18] sm:$0xff] }
  0x9e   : > { %629 = vmatmul.f32.gmra.mxu0 %v542_v26  ;;  %641 = vmatmul.f32.gmra.mxu2 %v550_v27  ;;  %v955_v27 = vld [vmem:[#allocation10 + $0x98] sm:$0xff] }
  0x9f   : > { %768 = vmatpush.msrb.mxu2 %v692_v28  ;;  %808 = vmatpush.msrb.mxu3 %v726_v29 }
  0xa0   : > { %850 = vmatpush.msrb.mxu0 %v693_v30  ;;  %890 = vmatpush.msrb.mxu1 %v727_v31  ;;  %v938_v30 = vld [vmem:[#allocation10 + $0x10] sm:$0xff] }
  0xa1   : > { %670 = vmatmul.f32.gmra.mxu1 %v543_v32  ;;  %682 = vmatmul.f32.gmra.mxu3 %v551_v33  ;;  %v954_v31 = vld [vmem:[#allocation10 + $0x90] sm:$0xff]  ;;  %v953_v33 = vld [vmem:[#allocation10 + $0x88] sm:$0xff] }
  0xa2   : > { %769 = vmatpush.msrb.mxu2 %v690_v34  ;;  %809 = vmatpush.msrb.mxu3 %v724_v35  ;;  %v937_v35 = vld [vmem:[#allocation10 + $0x8] sm:$0xff] }
  0xa3   : > { %851 = vmatpush.msrb.mxu0 %v691_v36  ;;  %891 = vmatpush.msrb.mxu1 %v725_v37  ;;  %v952_v36 = vld [vmem:[#allocation10 + $0x80] sm:$0xff] }
  0xa4   : > { %770 = vmatpush.msrb.mxu2 %v688_v38  ;;  %810 = vmatpush.msrb.mxu3 %v722_v39  ;;  %v936_v39 = vld [vmem:[#allocation10] sm:$0xff] }
  0xa5   : > { %852 = vmatpush.msrb.mxu0 %v689_v40  ;;  %892 = vmatpush.msrb.mxu1 %v723_v41 }
  0xa6   : > { %771 = vmatpush.msrb.mxu2 %v686_v42  ;;  %811 = vmatpush.msrb.mxu3 %v720_v43 }
  0xa7   : > { %853 = vmatpush.msrb.mxu0 %v687_v44  ;;  %893 = vmatpush.msrb.mxu1 %v721_v45 }
  0xa8   : > { %772 = vmatmul.f32.vlgmr.msrb.gmra.mxu2 %v552_v46  ;;  %812 = vmatpush.msrb.mxu3 %v718_v47 }
  0xa9   : > { %854 = vmatmul.f32.vlgmr.msrb.gmra.mxu0 %v552_v46  ;;  %894 = vmatpush.msrb.mxu1 %v719_v48  ;;  %v750_v46 = vld [vmem:[%s3325_s8] sm:$0x3] }
  0xaa   : > { %813 = vmatmul.f32.vlgmr.msrb.gmra.mxu3 %v553_v49  ;;  %895 = vmatmul.f32.vlgmr.msrb.gmra.mxu1 %v553_v49  ;;  %v2958_v48 = vld [vmem:[%s3324_s7] ss:$0 sm:$0xff]  ;;  %v2960_v49 = vperm.slane %v750_v46, 1 }
  0xab   : > { %972 = vmatpush.msra.mxu2 %v951_v56  ;;  %1013 = vmatpush.msra.mxu3 %v967_v57 }
  0xad   : > { %973 = vmatpush.msra.mxu2 %v950_v58  ;;  %1014 = vmatpush.msra.mxu3 %v966_v59 }
  0xaf   : > { %974 = vmatpush.msra.mxu2 %v949_v60  ;;  %1015 = vmatpush.msra.mxu3 %v965_v61 }
  0xb0   : > { %775 = vmatmul.f32.gmra.mxu2 %v554_v50 }
  0xb1   : > { %857 = vmatmul.f32.gmra.mxu0 %v554_v50  ;;  %975 = vmatpush.msra.mxu2 %v948_v63 }
  0xb2   : > { %816 = vmatmul.f32.gmra.mxu3 %v555_v51  ;;  %898 = vmatmul.f32.gmra.mxu1 %v555_v51 }
  0xb3   : > { %1016 = vmatpush.msra.mxu3 %v964_v1  ;;  %976 = vmatpush.msra.mxu2 %v947_v2 }
  0xb5   : > { %1017 = vmatpush.msra.mxu3 %v963_v3  ;;  %977 = vmatpush.msra.mxu2 %v946_v9 }
  0xb7   : > { %1018 = vmatpush.msra.mxu3 %v962_v11  ;;  %978 = vmatpush.msra.mxu2 %v945_v12 }
  0xb8   : > { %778 = vmatmul.f32.gmra.mxu2 %v556_v52 }
  0xb9   : > { %860 = vmatmul.f32.gmra.mxu0 %v556_v52  ;;  %1019 = vmatpush.msra.mxu3 %v961_v13 }
  0xba   : > { %819 = vmatmul.f32.gmra.mxu3 %v557_v53  ;;  %901 = vmatmul.f32.gmra.mxu1 %v557_v53 }
  0xbb   : > { %979 = vmatpush.msra.mxu2 %v944_v14  ;;  %1020 = vmatpush.msra.mxu3 %v960_v15 }
  0xbd   : > { %980 = vmatpush.msra.mxu2 %v943_v16  ;;  %1021 = vmatpush.msra.mxu3 %v959_v17 }
  0xbf   : > { %981 = vmatpush.msra.mxu2 %v942_v18  ;;  %1022 = vmatpush.msra.mxu3 %v958_v19 }
  0xc0   : > { %781 = vmatmul.f32.gmra.mxu2 %v558_v54 }
  0xc1   : > { %863 = vmatmul.f32.gmra.mxu0 %v558_v54  ;;  %982 = vmatpush.msra.mxu2 %v941_v20 }
  0xc2   : > { %822 = vmatmul.f32.gmra.mxu3 %v559_v55  ;;  %904 = vmatmul.f32.gmra.mxu1 %v559_v55  ;;  %v2966_v55 = vperm.slane %v750_v46, 0 }
  0xc3   : > { %1023 = vmatpush.msra.mxu3 %v957_v21  ;;  %983 = vmatpush.msra.mxu2 %v940_v22 }
  0xc5   : > { %1024 = vmatpush.msra.mxu3 %v956_v24  ;;  %984 = vmatpush.msra.mxu2 %v939_v25 }
  0xc7   : > { %1025 = vmatpush.msra.mxu3 %v955_v27  ;;  %985 = vmatpush.msra.mxu2 %v938_v30 }
  0xc8   : > { %784 = vmatmul.f32.gmra.mxu2 %v560_v62 }
  0xc9   : > { %866 = vmatmul.f32.gmra.mxu0 %v560_v62  ;;  %1026 = vmatpush.msra.mxu3 %v954_v31 }
  0xca   : > { %825 = vmatmul.f32.gmra.mxu3 %v561_v0  ;;  %907 = vmatmul.f32.gmra.mxu1 %v561_v0 }
  0xcb   : > { %1027 = vmatpush.msra.mxu3 %v953_v33  ;;  %986 = vmatpush.msra.mxu2 %v937_v35 }
  0xcd   : > { %1028 = vmatpush.msra.mxu3 %v952_v36  ;;  %987 = vmatpush.msra.mxu2 %v936_v39 }
  0xd0   : > { %787 = vmatmul.f32.gmra.mxu2 %v562_v4 }
  0xd1   : > { %869 = vmatmul.f32.gmra.mxu0 %v562_v4 }
  0xd2   : > { %828 = vmatmul.f32.gmra.mxu3 %v563_v5  ;;  %910 = vmatmul.f32.gmra.mxu1 %v563_v5 }
  0xd8   : > { %790 = vmatmul.f32.gmra.mxu2 %v564_v6 }
  0xd9   : > { %872 = vmatmul.f32.gmra.mxu0 %v564_v6 }
  0xda   : > { %831 = vmatmul.f32.gmra.mxu3 %v565_v7  ;;  %913 = vmatmul.f32.gmra.mxu1 %v565_v7 }
  0xe0   : > { %793 = vmatmul.f32.gmra.mxu2 %v566_v8 }
  0xe1   : > { %875 = vmatmul.f32.gmra.mxu0 %v566_v8 }
  0xe2   : > { %834 = vmatmul.f32.gmra.mxu3 %v567_v10  ;;  %916 = vmatmul.f32.gmra.mxu1 %v567_v10 }
  0xfd   : > { %v621_v23 = vpop.f32.mrf.mxu0 }
  0xfe   : > { %v622_v51 = vadd.f32 %v2958_v48, %v621_v23 }
 0x100   : > { %v662_v26 = vpop.f32.mrf.mxu1 }
 0x101   : > { %v2968_v56 = vadd.f32 %v662_v26, %v622_v51 }
 0x103   : > { %v2938_v28 = vpop.f32.mrf.mxu2 }
 0x104   : > { %v634_v35 = vadd.f32 %v2958_v48, %v2938_v28 }
 0x106   : > { %v2940_v29 = vpop.f32.mrf.mxu3 }
 0x107   : > { %v624_v32 = vpop.f32.mrf.mxu0  ;;  %v2998_v46 = vadd.f32 %v2940_v29, %v634_v35 }
 0x108   : > { %v625_v61 = vadd.f32 %v2958_v48, %v624_v32 }
 0x10a   : > { %v665_v34 = vpop.f32.mrf.mxu1 }
 0x10b   : > { %v2975_v4 = vadd.f32 %v665_v34, %v625_v61 }
 0x10d   : > { %v2942_v37 = vpop.f32.mrf.mxu2 }
 0x10e   : > { %v637_v61 = vadd.f32 %v2958_v48, %v2942_v37 }
 0x110   : > { %v2944_v38 = vpop.f32.mrf.mxu3 }
 0x111   : > { %v627_v40 = vpop.f32.mrf.mxu0 }
 0x112   : > { %v628_v9 = vadd.f32 %v2958_v48, %v627_v40 }
 0x114   : > { %v668_v41 = vpop.f32.mrf.mxu1 }
 0x115   : > { %v2982_v16 = vadd.f32 %v668_v41, %v628_v9  ;;  %v1229_v9 = vld [vmem:[#allocation11 + $0xb8] sm:$0xff] }
 0x117   : > { %v2946_v42 = vpop.f32.mrf.mxu2 }
 0x11a   : > { %v2948_v43 = vpop.f32.mrf.mxu3 }
 0x11b   : > { %v630_v44 = vpop.f32.mrf.mxu0 }
 0x11c   : > { %v631_v21 = vadd.f32 %v2958_v48, %v630_v44 }
 0x11e   : > { %v671_v45 = vpop.f32.mrf.mxu1 }
 0x11f   : > { %v2989_v30 = vadd.f32 %v671_v45, %v631_v21 }
 0x121   : > { %v2953_v47 = vpop.f32.mrf.mxu2 }
 0x124   : > { %v2962_v50 = vpop.f32.mrf.mxu3 }
 0x126   : > { %v855_v52 = vpop.f32.mrf.mxu0 }
 0x127   : > { %v856_v53 = vadd.f32 %v855_v52, %v2960_v49  ;;  %v896_v54 = vpop.f32.mrf.mxu1  ;;  %v1236_v52 = vld [vmem:[#allocation11 + $0xf0] sm:$0xff] }
 0x128   : > { %1238 = vmatpush.msra.mxu0 %v1236_v52  ;;  %v1223_v52 = vld [vmem:[#allocation11 + $0x88] sm:$0xff] }
 0x129   : > { %v897_v57 = vadd.f32 %v896_v54, %v856_v53  ;;  %v1237_v53 = vld [vmem:[#allocation11 + $0xf8] sm:$0xff]  ;;  %v1234_v54 = vld [vmem:[#allocation11 + $0xe0] sm:$0xff] }
 0x12a   : > { %1279 = vmatpush.msra.mxu1 %v1237_v53  ;;  %1239 = vmatpush.msra.mxu0 %v1234_v54  ;;  %v1221_v53 = vld [vmem:[#allocation11 + $0x78] sm:$0xff]  ;;  %v1218_v54 = vld [vmem:[#allocation11 + $0x60] sm:$0xff] }
 0x12b   : > { %v921_v58 = vmul.f32 %v897_v57, %v2968_v56  ;;  %v773_v59 = vpop.f32.mrf.mxu2 }
 0x12c   : > { %v774_v60 = vadd.f32 %v773_v59, %v2966_v55 }
 0x12d   : > { %1029 = vmatmul.f32.vlgmr.msra.gmra.mxu3 %v921_v58  ;;  %v814_v62 = vpop.f32.mrf.mxu3  ;;  %v1235_v58 = vld [vmem:[#allocation11 + $0xe8] sm:$0xff] }
 0x12e   : > { %v815_v63 = vadd.f32 %v814_v62, %v774_v60  ;;  %v858_v0 = vpop.f32.mrf.mxu0  ;;  %v1232_v60 = vld [vmem:[#allocation11 + $0xd0] sm:$0xff]  ;;  %v1233_v62 = vld [vmem:[#allocation11 + $0xd8] sm:$0xff]  ;;  %1280 = vmatpush.msra.mxu1 %v1235_v58  ;;  %v1214_v58 = vld [vmem:[#allocation11 + $0x40] sm:$0xff] }
 0x12f   : > { %v859_v1 = vadd.f32 %v858_v0, %v2960_v49  ;;  %v899_v2 = vpop.f32.mrf.mxu1  ;;  %1240 = vmatpush.msra.mxu0 %v1232_v60  ;;  %v1212_v60 = vld [vmem:[#allocation11 + $0x30] sm:$0xff] }
 0x130   : > { %v920_v3 = vmul.f32 %v815_v63, %v2968_v56  ;;  %1281 = vmatpush.msra.mxu1 %v1233_v62  ;;  %v1210_v62 = vld [vmem:[#allocation11 + $0x20] sm:$0xff] }
 0x131   : > { %v900_v5 = vadd.f32 %v899_v2, %v859_v1  ;;  %v1230_v1 = vld [vmem:[#allocation11 + $0xc0] sm:$0xff] }
 0x132   : > { %988 = vmatmul.f32.vlgmr.msra.gmra.mxu2 %v920_v3  ;;  %1241 = vmatpush.msra.mxu0 %v1230_v1  ;;  %v1208_v1 = vld [vmem:[#allocation11 + $0x10] sm:$0xff] }
 0x133   : > { %v776_v6 = vpop.f32.mrf.mxu2  ;;  %v923_v7 = vmul.f32 %v900_v5, %v2975_v4  ;;  %v1231_v5 = vld [vmem:[#allocation11 + $0xc8] sm:$0xff] }
 0x134   : > { %v777_v8 = vadd.f32 %v776_v6, %v2966_v55  ;;  %1282 = vmatpush.msra.mxu1 %v1231_v5  ;;  %v1206_v5 = vld [vmem:[#allocation11] sm:$0xff] }
 0x135   : > { %1032 = vmatmul.f32.gmra.mxu3 %v923_v7  ;;  %v817_v10 = vpop.f32.mrf.mxu3  ;;  %v1228_v7 = vld [vmem:[#allocation11 + $0xb0] sm:$0xff] }
 0x136   : > { %v818_v11 = vadd.f32 %v817_v10, %v777_v8  ;;  %v861_v12 = vpop.f32.mrf.mxu0  ;;  %v3007_v8 = vadd.f32 %v2944_v38, %v637_v61  ;;  %v1226_v10 = vld [vmem:[#allocation11 + $0xa0] sm:$0xff]  ;;  %1242 = vmatpush.msra.mxu0 %v1228_v7  ;;  %1283 = vmatpush.msra.mxu1 %v1229_v9  ;;  %v1213_v61 = vld [vmem:[#allocation11 + $0x38] sm:$0xff] }
 0x137   : > { %v862_v13 = vadd.f32 %v861_v12, %v2960_v49  ;;  %v902_v14 = vpop.f32.mrf.mxu1 }
 0x138   : > { %v922_v15 = vmul.f32 %v818_v11, %v2975_v4  ;;  %1243 = vmatpush.msra.mxu0 %v1226_v10 }
 0x139   : > { %v903_v17 = vadd.f32 %v902_v14, %v862_v13  ;;  %v1227_v13 = vld [vmem:[#allocation11 + $0xa8] sm:$0xff] }
 0x13a   : > { %991 = vmatmul.f32.gmra.mxu2 %v922_v15  ;;  %v1224_v15 = vld [vmem:[#allocation11 + $0x90] sm:$0xff]  ;;  %1284 = vmatpush.msra.mxu1 %v1227_v13 }
 0x13b   : > { %v779_v18 = vpop.f32.mrf.mxu2  ;;  %v925_v19 = vmul.f32 %v903_v17, %v2982_v16  ;;  %v640_v17 = vadd.f32 %v2958_v48, %v2946_v42  ;;  %1244 = vmatpush.msra.mxu0 %v1224_v15 }
 0x13c   : > { %v780_v20 = vadd.f32 %v779_v18, %v2966_v55 }
 0x13d   : > { %1035 = vmatmul.f32.gmra.mxu3 %v925_v19  ;;  %v820_v22 = vpop.f32.mrf.mxu3 }
 0x13e   : > { %v821_v23 = vadd.f32 %v820_v22, %v780_v20  ;;  %v864_v24 = vpop.f32.mrf.mxu0 }
 0x13f   : > { %v865_v25 = vadd.f32 %v864_v24, %v2960_v49  ;;  %v905_v26 = vpop.f32.mrf.mxu1 }
 0x140   : > { %v924_v27 = vmul.f32 %v821_v23, %v2982_v16  ;;  %v3016_v23 = vadd.f32 %v2948_v43, %v640_v17 }
 0x141   : > { %v906_v31 = vadd.f32 %v905_v26, %v865_v25 }
 0x142   : > { %994 = vmatmul.f32.gmra.mxu2 %v924_v27  ;;  %v643_v27 = vadd.f32 %v2958_v48, %v2953_v47 }
 0x143   : > { %v782_v32 = vpop.f32.mrf.mxu2  ;;  %v927_v33 = vmul.f32 %v906_v31, %v2989_v30 }
 0x144   : > { %v783_v34 = vadd.f32 %v782_v32, %v2966_v55 }
 0x145   : > { %1038 = vmatmul.f32.gmra.mxu3 %v927_v33  ;;  %v823_v36 = vpop.f32.mrf.mxu3 }
 0x146   : > { %v824_v39 = vadd.f32 %v823_v36, %v783_v34  ;;  %v867_v40 = vpop.f32.mrf.mxu0  ;;  %v3025_v36 = vadd.f32 %v2962_v50, %v643_v27  ;;  %v1220_v50 = vld [vmem:[#allocation11 + $0x70] sm:$0xff] }
 0x147   : > { %v868_v41 = vadd.f32 %v867_v40, %v2960_v49  ;;  %v908_v44 = vpop.f32.mrf.mxu1 }
 0x148   : > { %v926_v45 = vmul.f32 %v824_v39, %v2989_v30 }
 0x149   : > { %v909_v51 = vadd.f32 %v908_v44, %v868_v41 }
 0x14a   : > { %997 = vmatmul.f32.gmra.mxu2 %v926_v45 }
 0x14b   : > { %v785_v57 = vpop.f32.mrf.mxu2  ;;  %v929_v28 = vmul.f32 %v909_v51, %v2998_v46  ;;  %v1222_v51 = vld [vmem:[#allocation11 + $0x80] sm:$0xff] }
 0x14c   : > { %v786_v59 = vadd.f32 %v785_v57, %v2966_v55  ;;  %1245 = vmatpush.msra.mxu0 %v1222_v51  ;;  %v1219_v57 = vld [vmem:[#allocation11 + $0x68] sm:$0xff] }
 0x14d   : > { %1041 = vmatmul.f32.gmra.mxu3 %v929_v28  ;;  %v826_v29 = vpop.f32.mrf.mxu3  ;;  %v1217_v28 = vld [vmem:[#allocation11 + $0x58] sm:$0xff] }
 0x14e   : > { %v827_v63 = vadd.f32 %v826_v29, %v786_v59  ;;  %v870_v0 = vpop.f32.mrf.mxu0  ;;  %1246 = vmatpush.msra.mxu0 %v1220_v50  ;;  %v1215_v59 = vld [vmem:[#allocation11 + $0x48] sm:$0xff] }
 0x14f   : > { %v871_v2 = vadd.f32 %v870_v0, %v2960_v49  ;;  %v911_v3 = vpop.f32.mrf.mxu1  ;;  %v3033_v0 = vld [vmem:[%s3326_s9] ss:$0 sm:$0xff] }
 0x150   : > { %v928_v6 = vmul.f32 %v827_v63, %v2998_v46  ;;  %1247 = vmatpush.msra.mxu0 %v1218_v54  ;;  %v1211_v63 = vld [vmem:[#allocation11 + $0x28] sm:$0xff] }
 0x151   : > { %v912_v37 = vadd.f32 %v911_v3, %v871_v2  ;;  %v1209_v2 = vld [vmem:[#allocation11 + $0x18] sm:$0xff] }
 0x152   : > { %1000 = vmatmul.f32.gmra.mxu2 %v928_v6  ;;  %v1207_v6 = vld [vmem:[#allocation11 + $0x8] sm:$0xff] }
 0x153   : > { %v788_v11 = vpop.f32.mrf.mxu2  ;;  %v931_v12 = vmul.f32 %v912_v37, %v3007_v8 }
 0x154   : > { %v789_v14 = vadd.f32 %v788_v11, %v2966_v55 }
 0x155   : > { %1044 = vmatmul.f32.gmra.mxu3 %v931_v12  ;;  %v829_v38 = vpop.f32.mrf.mxu3 }
 0x156   : > { %v830_v18 = vadd.f32 %v829_v38, %v789_v14  ;;  %v873_v19 = vpop.f32.mrf.mxu0 }
 0x157   : > { %v874_v20 = vadd.f32 %v873_v19, %v2960_v49  ;;  %v914_v21 = vpop.f32.mrf.mxu1 }
 0x158   : > { %v930_v22 = vmul.f32 %v830_v18, %v3007_v8 }
 0x159   : > { %v915_v24 = vadd.f32 %v914_v21, %v874_v20 }
 0x15a   : > { %1003 = vmatmul.f32.gmra.mxu2 %v930_v22 }
 0x15b   : > { %v791_v25 = vpop.f32.mrf.mxu2  ;;  %v933_v42 = vmul.f32 %v915_v24, %v3016_v23 }
 0x15c   : > { %v792_v26 = vadd.f32 %v791_v25, %v2966_v55 }
 0x15d   : > { %1047 = vmatmul.f32.gmra.mxu3 %v933_v42  ;;  %v832_v31 = vpop.f32.mrf.mxu3 }
 0x15e   : > { %v833_v32 = vadd.f32 %v832_v31, %v792_v26  ;;  %v876_v33 = vpop.f32.mrf.mxu0 }
 0x15f   : > { %v877_v34 = vadd.f32 %v876_v33, %v2960_v49  ;;  %v917_v35 = vpop.f32.mrf.mxu1  ;;  %v1225_v49 = vld [vmem:[#allocation11 + $0x98] sm:$0xff] }
 0x160   : > { %v932_v43 = vmul.f32 %v833_v32, %v3016_v23  ;;  %1285 = vmatpush.msra.mxu1 %v1225_v49 }
 0x161   : > { %v918_v39 = vadd.f32 %v917_v35, %v877_v34 }
 0x162   : > { %1006 = vmatmul.f32.gmra.mxu2 %v932_v43  ;;  %1286 = vmatpush.msra.mxu1 %v1223_v52 }
 0x163   : > { %v794_v40 = vpop.f32.mrf.mxu2  ;;  %v935_v41 = vmul.f32 %v918_v39, %v3025_v36 }
 0x164   : > { %v795_v44 = vadd.f32 %v794_v40, %v2966_v55  ;;  %1287 = vmatpush.msra.mxu1 %v1221_v53  ;;  %v1216_v55 = vld [vmem:[#allocation11 + $0x50] sm:$0xff] }
 0x165   : > { %1050 = vmatmul.f32.gmra.mxu3 %v935_v41  ;;  %v835_v47 = vpop.f32.mrf.mxu3  ;;  %1248 = vmatpush.msra.mxu0 %v1216_v55 }
 0x166   : > { %v836_v48 = vadd.f32 %v835_v47, %v795_v44  ;;  %1288 = vmatpush.msra.mxu1 %v1219_v57 }
 0x167   : > { %1249 = vmatpush.msra.mxu0 %v1214_v58 }
 0x168   : > { %v934_v45 = vmul.f32 %v836_v48, %v3025_v36  ;;  %1289 = vmatpush.msra.mxu1 %v1217_v28 }
 0x169   : > { %1250 = vmatpush.msra.mxu0 %v1212_v60 }
 0x16a   : > { %1009 = vmatmul.f32.gmra.mxu2 %v934_v45  ;;  %1290 = vmatpush.msra.mxu1 %v1215_v59 }
 0x16b   : > { %1251 = vmatpush.msra.mxu0 %v1210_v62 }
 0x16c   : > { %1291 = vmatpush.msra.mxu1 %v1213_v61 }
 0x16d   : > { %1252 = vmatpush.msra.mxu0 %v1208_v1 }
 0x16e   : > { %1292 = vmatpush.msra.mxu1 %v1211_v63 }
 0x16f   : > { %1253 = vmatpush.msra.mxu0 %v1206_v5 }
 0x170   : > { %1293 = vmatpush.msra.mxu1 %v1209_v2 }
 0x172   : > { %1294 = vmatpush.msra.mxu1 %v1207_v6 }
 0x1b0   : > { %v1030_v29 = vpop.f32.mrf.mxu3 }
 0x1b5   : > { %v989_v3 = vpop.f32.mrf.mxu2 }
 0x1b6   : > { %v990_v7 = vadd.f32 %v3033_v0, %v989_v3 }
 0x1b8   : > { %v1031_v37 = vadd.f32 %v1030_v29, %v990_v7  ;;  %v1033_v9 = vpop.f32.mrf.mxu3 }
 0x1ba   : > { %v2075_v10 = vmul.f32 -1.442695, %v1031_v37 }
 0x1bc   : > { %2253 = vpow2.f32 %v2075_v10 }
 0x1bd   : > { %v992_v11 = vpop.f32.mrf.mxu2 }
 0x1be   : > { %v993_v12 = vadd.f32 %v3033_v0, %v992_v11 }
 0x1c0   : > { %v1034_v13 = vadd.f32 %v1033_v9, %v993_v12  ;;  %v1036_v14 = vpop.f32.mrf.mxu3 }
 0x1c2   : > { %v2254_v15 = vpop.eup %2253  ;;  %v2076_v17 = vmul.f32 -1.442695, %v1034_v13 }
 0x1c3   : > { %v1078_v38 = vadd.f32 1.0, %v2254_v15 }
 0x1c4   : > { %2255 = vpow2.f32 %v2076_v17 }
 0x1c5   : > { %2257 = vrcp.f32 %v1078_v38  ;;  %v995_v18 = vpop.f32.mrf.mxu2  ;;  %v1097_v33 = vand.u32 2147483648, %v1078_v38  ;;  %v1095_v43 = vand.u32 2147483647, %v1078_v38  ;;  %vm1091_vm1 = vweird.f32 %v1078_v38 }
 0x1c6   : > { %v996_v19 = vadd.f32 %v3033_v0, %v995_v18 }
 0x1c7   : > { %v1098_v45 = vor.u32 1.1754944e-38, %v1097_v33  ;;  %vm1096_vm3 = vcmp.eq.f32.partialorder %v1095_v43, 8.507059e+37 }
 0x1c8   : > { %v1037_v20 = vadd.f32 %v1036_v14, %v996_v19  ;;  %v1039_v21 = vpop.f32.mrf.mxu3 }
 0x1ca   : > { %v2256_v22 = vpop.eup %2255  ;;  %v2077_v24 = vmul.f32 -1.442695, %v1037_v20 }
 0x1cb   : > { %v2258_v25 = vpop.eup %2257  ;;  %v1079_v42 = vadd.f32 1.0, %v2256_v22 }
 0x1cc   : > { %2259 = vpow2.f32 %v2077_v24  ;;  %v1087_v26 = vmul.f32 %v2258_v25, %v1078_v38  ;;  %vm1092_vm0 = vweird.f32 %v2258_v25 }
 0x1cd   : > { %2261 = vrcp.f32 %v1079_v42  ;;  %v998_v27 = vpop.f32.mrf.mxu2  ;;  %vm1093_vm2 = vmor %vm1091_vm1, %vm1092_vm0  ;;  %v1112_v57 = vand.u32 2147483648, %v1079_v42  ;;  %v1110_v58 = vand.u32 2147483647, %v1079_v42  ;;  %vm1106_vm5 = vweird.f32 %v1079_v42 }
 0x1ce   : > { %v999_v31 = vadd.f32 %v3033_v0, %v998_v27  ;;  %v1088_v32 = vsub.f32 1.0, %v1087_v26 }
 0x1cf   : > { %v1113_v1 = vor.u32 1.1754944e-38, %v1112_v57  ;;  %vm1111_vm7 = vcmp.eq.f32.partialorder %v1110_v58, 8.507059e+37  ;;  %v1396_v57 = vld [vmem:[#allocation13 + $0x1e0] sm:$0xff] }
 0x1d0   : > { %v1040_v34 = vadd.f32 %v1039_v21, %v999_v31  ;;  %v1089_v35 = vmul.f32 %v2258_v25, %v1088_v32  ;;  %v1042_v39 = vpop.f32.mrf.mxu3 }
 0x1d2   : > { %v2260_v40 = vpop.eup %2259  ;;  %v2078_v41 = vmul.f32 -1.442695, %v1040_v34  ;;  %v1090_v44 = vadd.f32 %v2258_v25, %v1089_v35 }
 0x1d3   : > { %v2262_v47 = vpop.eup %2261  ;;  %v1080_v48 = vadd.f32 1.0, %v2260_v40 }
 0x1d4   : > { %2263 = vpow2.f32 %v2078_v41  ;;  %v1094_v49 = vsel %vm1093_vm2, %v2258_v25, %v1090_v44  ;;  %v1102_v51 = vmul.f32 %v2262_v47, %v1079_v42  ;;  %vm1107_vm4 = vweird.f32 %v2262_v47 }
 0x1d5   : > { %2265 = vrcp.f32 %v1080_v48  ;;  %v1001_v52 = vpop.f32.mrf.mxu2  ;;  %v1099_v50 = vsel %vm1096_vm3, %v1098_v45, %v1094_v49  ;;  %vm1108_vm6 = vmor %vm1106_vm5, %vm1107_vm4  ;;  %v1127_v9 = vand.u32 2147483648, %v1080_v48  ;;  %v1125_v12 = vand.u32 2147483647, %v1080_v48 }
 0x1d6   : > { %v1002_v53 = vadd.f32 %v3033_v0, %v1001_v52  ;;  %1254 = vmatmul.f32.vlgmr.msra.gmra.mxu0 %v1099_v50  ;;  %1295 = vmatmul.f32.vlgmr.msra.gmra.mxu1 %v1099_v50  ;;  %v1103_v54 = vsub.f32 1.0, %v1102_v51  ;;  %vm1121_vm9 = vweird.f32 %v1080_v48  ;;  %v1366_v51 = vld [vmem:[#allocation13 + $0xf0] sm:$0xff]  ;;  %v1364_v50 = vld [vmem:[#allocation13 + $0xe0] sm:$0xff] }
 0x1d7   : > { %v1128_v18 = vor.u32 1.1754944e-38, %v1127_v9  ;;  %vm1126_vm11 = vcmp.eq.f32.partialorder %v1125_v12, 8.507059e+37  ;;  %v1398_v52 = vld [vmem:[#allocation13 + $0x1f0] sm:$0xff]  ;;  %1406 = vmatpush.msrb.mxu2 %v1366_v51  ;;  %v1387_v51 = vld [vmem:[#allocation13 + $0x198] sm:$0xff] }
 0x1d8   : > { %v1043_v55 = vadd.f32 %v1042_v39, %v1002_v53  ;;  %v1104_v28 = vmul.f32 %v2262_v47, %v1103_v54  ;;  %v1045_v63 = vpop.f32.mrf.mxu3  ;;  %1447 = vmatpush.msrb.mxu3 %v1398_v52  ;;  %v1358_v12 = vld [vmem:[#allocation13 + $0xb0] sm:$0xff] }
 0x1d9   : > { %1407 = vmatpush.msrb.mxu2 %v1364_v50  ;;  %v1382_v50 = vld [vmem:[#allocation13 + $0x170] sm:$0xff] }
 0x1da   : > { %v2264_v59 = vpop.eup %2263  ;;  %v2079_v60 = vmul.f32 -1.442695, %v1043_v55  ;;  %v1105_v61 = vadd.f32 %v2262_v47, %v1104_v28  ;;  %v1367_v55 = vld [vmem:[#allocation13 + $0xf8] sm:$0xff]  ;;  %v1362_v28 = vld [vmem:[#allocation13 + $0xd0] sm:$0xff]  ;;  %1448 = vmatpush.msrb.mxu3 %v1396_v57  ;;  %v1348_v57 = vld [vmem:[#allocation13 + $0x60] sm:$0xff] }
 0x1db   : > { %v2266_v29 = vpop.eup %2265  ;;  %v1081_v62 = vadd.f32 1.0, %v2264_v59  ;;  %1488 = vmatpush.msrb.mxu0 %v1367_v55  ;;  %1408 = vmatpush.msrb.mxu2 %v1362_v28  ;;  %v1385_v55 = vld [vmem:[#allocation13 + $0x188] sm:$0xff] }
 0x1dc   : > { %2267 = vpow2.f32 %v2079_v60  ;;  %v1109_v2 = vsel %vm1108_vm6, %v2262_v47, %v1105_v61  ;;  %v1117_v3 = vmul.f32 %v2266_v29, %v1080_v48  ;;  %vm1122_vm8 = vweird.f32 %v2266_v29  ;;  %v1394_v61 = vld [vmem:[#allocation13 + $0x1d0] sm:$0xff] }
 0x1dd   : > { %2269 = vrcp.f32 %v1081_v62  ;;  %v1004_v5 = vpop.f32.mrf.mxu2  ;;  %v1114_v6 = vsel %vm1111_vm7, %v1113_v1, %v1109_v2  ;;  %vm1123_vm10 = vmor %vm1121_vm9, %vm1122_vm8  ;;  %v1142_v26 = vand.u32 2147483648, %v1081_v62  ;;  %v1140_v32 = vand.u32 2147483647, %v1081_v62  ;;  %1449 = vmatpush.msrb.mxu3 %v1394_v61  ;;  %v1383_v61 = vld [vmem:[#allocation13 + $0x178] sm:$0xff] }
 0x1de   : > { %v1005_v7 = vadd.f32 %v3033_v0, %v1004_v5  ;;  %1257 = vmatmul.f32.gmra.mxu0 %v1114_v6  ;;  %1298 = vmatmul.f32.gmra.mxu1 %v1114_v6  ;;  %v1118_v37 = vsub.f32 1.0, %v1117_v3  ;;  %vm1136_vm13 = vweird.f32 %v1081_v62  ;;  %v1360_v3 = vld [vmem:[#allocation13 + $0xc0] sm:$0xff]  ;;  %v1363_v6 = vld [vmem:[#allocation13 + $0xd8] sm:$0xff] }
 0x1df   : > { %v1143_v40 = vor.u32 1.1754944e-38, %v1142_v26  ;;  %vm1141_vm15 = vcmp.eq.f32.partialorder %v1140_v32, 8.507059e+37  ;;  %v1392_v5 = vld [vmem:[#allocation13 + $0x1c0] sm:$0xff]  ;;  %1409 = vmatpush.msrb.mxu2 %v1360_v3  ;;  %v1391_v26 = vld [vmem:[#allocation13 + $0x1b8] sm:$0xff] }
 0x1e0   : > { %v1046_v10 = vadd.f32 %v1045_v63, %v1005_v7  ;;  %v1119_v11 = vmul.f32 %v2266_v29, %v1118_v37  ;;  %v1048_v21 = vpop.f32.mrf.mxu3  ;;  %1450 = vmatpush.msrb.mxu3 %v1392_v5 }
 0x1e1   : > { %1410 = vmatpush.msrb.mxu2 %v1358_v12  ;;  %v1342_v12 = vld [vmem:[#allocation13 + $0x30] sm:$0xff] }
 0x1e2   : > { %v2268_v13 = vpop.eup %2267  ;;  %v2080_v14 = vmul.f32 -1.442695, %v1046_v10  ;;  %v1120_v15 = vadd.f32 %v2266_v29, %v1119_v11 }
 0x1e3   : > { %v2270_v17 = vpop.eup %2269  ;;  %v3041_v38 = vadd.f32 1.0, %v2268_v13  ;;  %v1395_v13 = vld [vmem:[#allocation13 + $0x1d8] sm:$0xff] }
 0x1e4   : > { %2271 = vpow2.f32 %v2080_v14  ;;  %v1124_v19 = vsel %vm1123_vm10, %v2266_v29, %v1120_v15  ;;  %v1132_v20 = vmul.f32 %v2270_v17, %v1081_v62  ;;  %vm1137_vm12 = vweird.f32 %v2270_v17  ;;  %v1365_v29 = vld [vmem:[#allocation13 + $0xe8] sm:$0xff]  ;;  %v1390_v15 = vld [vmem:[#allocation13 + $0x1b0] sm:$0xff] }
 0x1e5   : > { %2273 = vrcp.f32 %v3041_v38  ;;  %v1007_v22 = vpop.f32.mrf.mxu2  ;;  %v1129_v24 = vsel %vm1126_vm11, %v1128_v18, %v1124_v19  ;;  %vm1138_vm14 = vmor %vm1136_vm13, %vm1137_vm12  ;;  %v1157_v54 = vand.u32 2147483648, %v3041_v38  ;;  %v1155_v60 = vand.u32 2147483647, %v3041_v38  ;;  %v1397_v62 = vld [vmem:[#allocation13 + $0x1e8] sm:$0xff]  ;;  %1489 = vmatpush.msrb.mxu0 %v1365_v29  ;;  %v1356_v18 = vld [vmem:[#allocation13 + $0xa0] sm:$0xff]  ;;  %1451 = vmatpush.msrb.mxu3 %v1390_v15 }
 0x1e6   : > { %v1008_v25 = vadd.f32 %v3033_v0, %v1007_v22  ;;  %1260 = vmatmul.f32.gmra.mxu0 %v1129_v24  ;;  %1301 = vmatmul.f32.gmra.mxu1 %v1129_v24  ;;  %v1133_v42 = vsub.f32 1.0, %v1132_v20  ;;  %vm1151_vm1 = vweird.f32 %v3041_v38  ;;  %v1393_v19 = vld [vmem:[#allocation13 + $0x1c8] sm:$0xff]  ;;  %v1359_v22 = vld [vmem:[#allocation13 + $0xb8] sm:$0xff]  ;;  %v1374_v15 = vld [vmem:[#allocation13 + $0x130] sm:$0xff] }
 0x1e7   : > { %v1158_v9 = vor.u32 1.1754944e-38, %v1157_v54  ;;  %vm1156_vm3 = vcmp.eq.f32.partialorder %v1155_v60, 8.507059e+37  ;;  %1490 = vmatpush.msrb.mxu0 %v1363_v6  ;;  %1411 = vmatpush.msrb.mxu2 %v1356_v18  ;;  %v1351_v60 = vld [vmem:[#allocation13 + $0x78] sm:$0xff]  ;;  %v1344_v6 = vld [vmem:[#allocation13 + $0x40] sm:$0xff] }
 0x1e8   : > { %v1049_v27 = vadd.f32 %v1048_v21, %v1008_v25  ;;  %v1134_v31 = vmul.f32 %v2270_v17, %v1133_v42  ;;  %v1051_v53 = vpop.f32.mrf.mxu3  ;;  %v1388_v21 = vld [vmem:[#allocation13 + $0x1a0] sm:$0xff]  ;;  %v1354_v42 = vld [vmem:[#allocation13 + $0x90] sm:$0xff] }
 0x1e9   : > { %1452 = vmatpush.msrb.mxu3 %v1388_v21  ;;  %1412 = vmatpush.msrb.mxu2 %v1354_v42  ;;  %v1372_v21 = vld [vmem:[#allocation13 + $0x120] sm:$0xff]  ;;  %v1375_v42 = vld [vmem:[#allocation13 + $0x138] sm:$0xff] }
 0x1ea   : > { %v2272_v33 = vpop.eup %2271  ;;  %v2081_v34 = vmul.f32 -1.442695, %v1049_v27  ;;  %v1135_v35 = vadd.f32 %v2270_v17, %v1134_v31  ;;  %v1386_v27 = vld [vmem:[#allocation13 + $0x190] sm:$0xff]  ;;  %v1357_v31 = vld [vmem:[#allocation13 + $0xa8] sm:$0xff] }
 0x1eb   : > { %v2274_v43 = vpop.eup %2273  ;;  %v3045_v39 = vadd.f32 1.0, %v2272_v33  ;;  %1453 = vmatpush.msrb.mxu3 %v1386_v27 }
 0x1ec   : > { %2275 = vpow2.f32 %v2081_v34  ;;  %v1139_v41 = vsel %vm1138_vm14, %v2270_v17, %v1135_v35  ;;  %v1147_v44 = vmul.f32 %v2274_v43, %v3041_v38  ;;  %vm1152_vm0 = vweird.f32 %v2274_v43  ;;  %v1361_v17 = vld [vmem:[#allocation13 + $0xc8] sm:$0xff]  ;;  %v1352_v34 = vld [vmem:[#allocation13 + $0x80] sm:$0xff] }
 0x1ed   : > { %2277 = vrcp.f32 %v3045_v39  ;;  %v1010_v47 = vpop.f32.mrf.mxu2  ;;  %v1144_v48 = vsel %vm1141_vm15, %v1143_v40, %v1139_v41  ;;  %vm1153_vm2 = vmor %vm1151_vm1, %vm1152_vm0  ;;  %v1172_v20 = vand.u32 2147483648, %v3045_v39  ;;  %v1170_v25 = vand.u32 2147483647, %v3045_v39  ;;  %1491 = vmatpush.msrb.mxu0 %v1361_v17  ;;  %v1389_v35 = vld [vmem:[#allocation13 + $0x1a8] sm:$0xff]  ;;  %1413 = vmatpush.msrb.mxu2 %v1352_v34 }
 0x1ee   : > { %v1011_v45 = vadd.f32 %v3033_v0, %v1010_v47  ;;  %1263 = vmatmul.f32.gmra.mxu0 %v1144_v48  ;;  %1304 = vmatmul.f32.gmra.mxu1 %v1144_v48  ;;  %v1148_v49 = vsub.f32 1.0, %v1147_v44  ;;  %v1399_v0 = vld [vmem:[#allocation13 + $0x1f8] sm:$0xff]  ;;  %vm1166_vm5 = vweird.f32 %v3045_v39  ;;  %v1345_v17 = vld [vmem:[#allocation13 + $0x48] sm:$0xff] }
 0x1ef   : > { %1529 = vmatpush.msrb.mxu1 %v1399_v0  ;;  %1492 = vmatpush.msrb.mxu0 %v1359_v22  ;;  %v1173_v41 = vor.u32 1.1754944e-38, %v1172_v20  ;;  %vm1171_vm7 = vcmp.eq.f32.partialorder %v1170_v25, 8.507059e+37  ;;  %v1355_v48 = vld [vmem:[#allocation13 + $0x98] sm:$0xff]  ;;  %v1346_v0 = vld [vmem:[#allocation13 + $0x50] sm:$0xff]  ;;  %v1377_v20 = vld [vmem:[#allocation13 + $0x148] sm:$0xff] }
 0x1f0   : > { %v1052_v58 = vadd.f32 %v1051_v53, %v1011_v45  ;;  %v1149_v59 = vmul.f32 %v2274_v43, %v1148_v49  ;;  %v1350_v49 = vld [vmem:[#allocation13 + $0x70] sm:$0xff]  ;;  %v1353_v53 = vld [vmem:[#allocation13 + $0x88] sm:$0xff]  ;;  %v1343_v22 = vld [vmem:[#allocation13 + $0x38] sm:$0xff] }
 0x1f1   : > { %1530 = vmatpush.msrb.mxu1 %v1397_v62  ;;  %1493 = vmatpush.msrb.mxu0 %v1357_v31  ;;  %v1378_v62 = vld [vmem:[#allocation13 + $0x150] sm:$0xff]  ;;  %v1373_v34 = vld [vmem:[#allocation13 + $0x128] sm:$0xff] }
 0x1f2   : > { %v2276_v63 = vpop.eup %2275  ;;  %v2082_v1 = vmul.f32 -1.442695, %v1052_v58  ;;  %v1150_v2 = vadd.f32 %v2274_v43, %v1149_v59  ;;  %1414 = vmatpush.msrb.mxu2 %v1350_v49  ;;  %v1380_v59 = vld [vmem:[#allocation13 + $0x160] sm:$0xff]  ;;  %v1338_v25 = vld [vmem:[#allocation13 + $0x10] sm:$0xff] }
 0x1f3   : > { %v3053_v7 = vpop.eup %2277  ;;  %v3055_v37 = vadd.f32 1.0, %v2276_v63  ;;  %1531 = vmatpush.msrb.mxu1 %v1395_v13  ;;  %1494 = vmatpush.msrb.mxu0 %v1355_v48  ;;  %v1349_v63 = vld [vmem:[#allocation13 + $0x68] sm:$0xff]  ;;  %v1379_v13 = vld [vmem:[#allocation13 + $0x158] sm:$0xff]  ;;  %v1370_v31 = vld [vmem:[#allocation13 + $0x110] sm:$0xff] }
 0x1f4   : > { %2279 = vpow2.f32 %v2082_v1  ;;  %v1154_v10 = vsel %vm1153_vm2, %v2274_v43, %v1150_v2  ;;  %v1162_v11 = vmul.f32 %v3053_v7, %v3045_v39  ;;  %vm1167_vm4 = vweird.f32 %v3053_v7  ;;  %v1384_v39 = vld [vmem:[#allocation13 + $0x180] sm:$0xff]  ;;  %1415 = vmatpush.msrb.mxu2 %v1348_v57 }
 0x1f5   : > { %2281 = vrcp.f32 %v3055_v37  ;;  %v1159_v14 = vsel %vm1156_vm3, %v1158_v9, %v1154_v10  ;;  %1532 = vmatpush.msrb.mxu1 %v1393_v19  ;;  %vm1168_vm6 = vmor %vm1166_vm5, %vm1167_vm4  ;;  %v1187_v54 = vand.u32 2147483648, %v3055_v37  ;;  %1454 = vmatpush.msrb.mxu3 %v1384_v39  ;;  %v1185_v58 = vand.u32 2147483647, %v3055_v37  ;;  %v1347_v10 = vld [vmem:[#allocation13 + $0x58] sm:$0xff]  ;;  %v1340_v19 = vld [vmem:[#allocation13 + $0x20] sm:$0xff] }
 0x1f6   : > { %1266 = vmatmul.f32.gmra.mxu0 %v1159_v14  ;;  %1307 = vmatmul.f32.gmra.mxu1 %v1159_v14  ;;  %v1163_v38 = vsub.f32 1.0, %v1162_v11  ;;  %vm1181_vm9 = vweird.f32 %v3055_v37 }
 0x1f7   : > { %1533 = vmatpush.msrb.mxu1 %v1391_v26  ;;  %1455 = vmatpush.msrb.mxu3 %v1382_v50  ;;  %v1188_v2 = vor.u32 1.1754944e-38, %v1187_v54  ;;  %vm1186_vm11 = vcmp.eq.f32.partialorder %v1185_v58, 8.507059e+37 }
 0x1f8   : > { %v1164_v24 = vmul.f32 %v3053_v7, %v1163_v38  ;;  %1495 = vmatpush.msrb.mxu0 %v1353_v53  ;;  %1416 = vmatpush.msrb.mxu2 %v1346_v0 }
 0x1f9   : > { %1534 = vmatpush.msrb.mxu1 %v1389_v35  ;;  %1456 = vmatpush.msrb.mxu3 %v1380_v59  ;;  %v1336_v35 = vld [vmem:[#allocation13] sm:$0xff] }
 0x1fa   : > { %v2280_v32 = vpop.eup %2279  ;;  %v1165_v33 = vadd.f32 %v3053_v7, %v1164_v24  ;;  %1496 = vmatpush.msrb.mxu0 %v1351_v60  ;;  %1417 = vmatpush.msrb.mxu2 %v1344_v6 }
 0x1fb   : > { %v2282_v43 = vpop.eup %2281  ;;  %v3067_v40 = vadd.f32 1.0, %v2280_v32  ;;  %1535 = vmatpush.msrb.mxu1 %v1387_v51  ;;  %1457 = vmatpush.msrb.mxu3 %v1378_v62  ;;  %v1341_v32 = vld [vmem:[#allocation13 + $0x28] sm:$0xff] }
 0x1fc   : > { %v1169_v44 = vsel %vm1168_vm6, %v3053_v7, %v1165_v33  ;;  %v1177_v47 = vmul.f32 %v2282_v43, %v3055_v37  ;;  %vm1182_vm8 = vweird.f32 %v2282_v43  ;;  %v1381_v7 = vld [vmem:[#allocation13 + $0x168] sm:$0xff]  ;;  %1497 = vmatpush.msrb.mxu0 %v1349_v63  ;;  %v1376_v37 = vld [vmem:[#allocation13 + $0x140] sm:$0xff]  ;;  %1418 = vmatpush.msrb.mxu2 %v1342_v12 }
 0x1fd   : > { %2283 = vrcp.f32 %v3067_v40  ;;  %v1174_v45 = vsel %vm1171_vm7, %v1173_v41, %v1169_v44  ;;  %1536 = vmatpush.msrb.mxu1 %v1385_v55  ;;  %vm1183_vm10 = vmor %vm1181_vm9, %vm1182_vm8  ;;  %v1202_v14 = vand.u32 2147483648, %v3067_v40  ;;  %v1200_v18 = vand.u32 2147483647, %v3067_v40  ;;  %1458 = vmatpush.msrb.mxu3 %v1376_v37  ;;  %v1368_v41 = vld [vmem:[#allocation13 + $0x100] sm:$0xff]  ;;  %v1337_v44 = vld [vmem:[#allocation13 + $0x8] sm:$0xff] }
 0x1fe   : > { %1269 = vmatmul.f32.gmra.mxu0 %v1174_v45  ;;  %1310 = vmatmul.f32.gmra.mxu1 %v1174_v45  ;;  %v1178_v52 = vsub.f32 1.0, %v1177_v47  ;;  %vm1196_vm13 = vweird.f32 %v3067_v40  ;;  %v1369_v47 = vld [vmem:[#allocation13 + $0x108] sm:$0xff] }
 0x1ff   : > { %1537 = vmatpush.msrb.mxu1 %v1383_v61  ;;  %1498 = vmatpush.msrb.mxu0 %v1347_v10  ;;  %v1203_v26 = vor.u32 1.1754944e-38, %v1202_v14  ;;  %vm1201_vm15 = vcmp.eq.f32.partialorder %v1200_v18, 8.507059e+37 }
 0x200   : > { %v1179_v28 = vmul.f32 %v2282_v43, %v1178_v52  ;;  %1459 = vmatpush.msrb.mxu3 %v1374_v15  ;;  %1419 = vmatpush.msrb.mxu2 %v1340_v19 }
 0x201   : > { %1538 = vmatpush.msrb.mxu1 %v1381_v7  ;;  %1499 = vmatpush.msrb.mxu0 %v1345_v17 }
 0x202   : > { %v1180_v29 = vadd.f32 %v2282_v43, %v1179_v28  ;;  %1460 = vmatpush.msrb.mxu3 %v1372_v21  ;;  %1420 = vmatpush.msrb.mxu2 %v1338_v25 }
 0x203   : > { %v2284_v1 = vpop.eup %2283  ;;  %1539 = vmatpush.msrb.mxu1 %v1379_v13  ;;  %1500 = vmatpush.msrb.mxu0 %v1343_v22 }
 0x204   : > { %v1184_v3 = vsel %vm1183_vm10, %v2282_v43, %v1180_v29  ;;  %v1192_v5 = vmul.f32 %v2284_v1, %v3067_v40  ;;  %vm1197_vm12 = vweird.f32 %v2284_v1  ;;  %1461 = vmatpush.msrb.mxu3 %v1370_v31  ;;  %1421 = vmatpush.msrb.mxu2 %v1336_v35  ;;  %v1339_v43 = vld [vmem:[#allocation13 + $0x18] sm:$0xff] }
 0x205   : > { %v1189_v9 = vsel %vm1186_vm11, %v1188_v2, %v1184_v3  ;;  %vm1198_vm14 = vmor %vm1196_vm13, %vm1197_vm12  ;;  %1540 = vmatpush.msrb.mxu1 %v1377_v20  ;;  %1501 = vmatpush.msrb.mxu0 %v1341_v32  ;;  %v1371_v40 = vld [vmem:[#allocation13 + $0x118] sm:$0xff] }
 0x206   : > { %1272 = vmatmul.f32.gmra.mxu0 %v1189_v9  ;;  %1313 = vmatmul.f32.gmra.mxu1 %v1189_v9  ;;  %v1193_v11 = vsub.f32 1.0, %v1192_v5  ;;  %v1400_v9 = vld [vmem:[%s3327_s10] sm:$0x3] }
 0x207   : > { %1541 = vmatpush.msrb.mxu1 %v1375_v42  ;;  %1502 = vmatpush.msrb.mxu0 %v1339_v43  ;;  %v3102_v37 = vperm.slane %v1400_v9, 1  ;;  %v3105_v12 = vperm.slane %v1400_v9, 0 }
 0x208   : > { %v1194_v38 = vmul.f32 %v2284_v1, %v1193_v11  ;;  %1462 = vmatpush.msrb.mxu3 %v1368_v41 }
 0x209   : > { %1542 = vmatpush.msrb.mxu1 %v1373_v34  ;;  %1503 = vmatpush.msrb.mxu0 %v1337_v44 }
 0x20a   : > { %v1195_v24 = vadd.f32 %v2284_v1, %v1194_v38 }
 0x20b   : > { %1543 = vmatpush.msrb.mxu1 %v1371_v40 }
 0x20c   : > { %v1199_v27 = vsel %vm1198_vm14, %v2284_v1, %v1195_v24 }
 0x20d   : > { %v1204_v33 = vsel %vm1201_vm15, %v1203_v26, %v1199_v27  ;;  %1544 = vmatpush.msrb.mxu1 %v1369_v47 }
 0x20e   : > { %1275 = vmatmul.f32.gmra.mxu0 %v1204_v33  ;;  %1316 = vmatmul.f32.gmra.mxu1 %v1204_v33 }
 0x253   : > { %v1255_v39 = vpop.f32.mrf.mxu0  ;;  %v1296_v48 = vpop.f32.mrf.mxu1 }
 0x254   : > { %v1320_v45 = vmul.f32 %v1255_v39, %v2968_v56  ;;  %v1321_v49 = vmul.f32 %v1296_v48, %v2968_v56 }
 0x256   : > { %1422 = vmatmul.f32.vlgmr.msrb.gmra.mxu2 %v1320_v45  ;;  %1463 = vmatmul.f32.vlgmr.msrb.gmra.mxu3 %v1321_v49 }
 0x257   : > { %1504 = vmatmul.f32.vlgmr.msrb.gmra.mxu0 %v1320_v45  ;;  %1545 = vmatmul.f32.vlgmr.msrb.gmra.mxu1 %v1321_v49 }
 0x25b   : > { %v1258_v51 = vpop.f32.mrf.mxu0  ;;  %v1299_v52 = vpop.f32.mrf.mxu1 }
 0x25c   : > { %v1322_v50 = vmul.f32 %v1258_v51, %v2975_v4  ;;  %v1323_v53 = vmul.f32 %v1299_v52, %v2975_v4 }
 0x25e   : > { %1425 = vmatmul.f32.gmra.mxu2 %v1322_v50  ;;  %1466 = vmatmul.f32.gmra.mxu3 %v1323_v53 }
 0x25f   : > { %1507 = vmatmul.f32.gmra.mxu0 %v1322_v50  ;;  %1548 = vmatmul.f32.gmra.mxu1 %v1323_v53 }
 0x263   : > { %v1261_v54 = vpop.f32.mrf.mxu0  ;;  %v1302_v57 = vpop.f32.mrf.mxu1 }
 0x264   : > { %v1324_v55 = vmul.f32 %v1261_v54, %v2982_v16  ;;  %v1325_v56 = vmul.f32 %v1302_v57, %v2982_v16 }
 0x266   : > { %1428 = vmatmul.f32.gmra.mxu2 %v1324_v55  ;;  %1469 = vmatmul.f32.gmra.mxu3 %v1325_v56 }
 0x267   : > { %1510 = vmatmul.f32.gmra.mxu0 %v1324_v55  ;;  %1551 = vmatmul.f32.gmra.mxu1 %v1325_v56 }
 0x26b   : > { %v1264_v28 = vpop.f32.mrf.mxu0  ;;  %v1305_v58 = vpop.f32.mrf.mxu1 }
 0x26c   : > { %v1326_v59 = vmul.f32 %v1264_v28, %v2989_v30  ;;  %v1327_v4 = vmul.f32 %v1305_v58, %v2989_v30 }
 0x26e   : > { %1431 = vmatmul.f32.gmra.mxu2 %v1326_v59  ;;  %1472 = vmatmul.f32.gmra.mxu3 %v1327_v4 }
 0x26f   : > { %1513 = vmatmul.f32.gmra.mxu0 %v1326_v59  ;;  %1554 = vmatmul.f32.gmra.mxu1 %v1327_v4 }
 0x273   : > { %v1267_v60 = vpop.f32.mrf.mxu0  ;;  %v1308_v0 = vpop.f32.mrf.mxu1 }
 0x274   : > { %v1328_v61 = vmul.f32 %v1267_v60, %v2998_v46  ;;  %v1329_v16 = vmul.f32 %v1308_v0, %v2998_v46 }
 0x276   : > { %1434 = vmatmul.f32.gmra.mxu2 %v1328_v61  ;;  %1475 = vmatmul.f32.gmra.mxu3 %v1329_v16 }
 0x277   : > { %1516 = vmatmul.f32.gmra.mxu0 %v1328_v61  ;;  %1557 = vmatmul.f32.gmra.mxu1 %v1329_v16 }
 0x27b   : > { %v1270_v29 = vpop.f32.mrf.mxu0  ;;  %v1311_v62 = vpop.f32.mrf.mxu1 }
 0x27c   : > { %v1330_v63 = vmul.f32 %v1270_v29, %v3007_v8  ;;  %v1331_v30 = vmul.f32 %v1311_v62, %v3007_v8 }
 0x27e   : > { %1437 = vmatmul.f32.gmra.mxu2 %v1330_v63  ;;  %1478 = vmatmul.f32.gmra.mxu3 %v1331_v30 }
 0x27f   : > { %1519 = vmatmul.f32.gmra.mxu0 %v1330_v63  ;;  %1560 = vmatmul.f32.gmra.mxu1 %v1331_v30 }
 0x283   : > { %v1273_v1 = vpop.f32.mrf.mxu0  ;;  %v1314_v2 = vpop.f32.mrf.mxu1 }
 0x284   : > { %v1332_v3 = vmul.f32 %v1273_v1, %v3016_v23  ;;  %v1333_v46 = vmul.f32 %v1314_v2, %v3016_v23 }
 0x286   : > { %1440 = vmatmul.f32.gmra.mxu2 %v1332_v3  ;;  %1481 = vmatmul.f32.gmra.mxu3 %v1333_v46 }
 0x287   : > { %1522 = vmatmul.f32.gmra.mxu0 %v1332_v3  ;;  %1563 = vmatmul.f32.gmra.mxu1 %v1333_v46 }
 0x28b   : > { %v1276_v5 = vpop.f32.mrf.mxu0  ;;  %v1317_v6 = vpop.f32.mrf.mxu1 }
 0x28c   : > { %v1334_v7 = vmul.f32 %v1276_v5, %v3025_v36  ;;  %v1335_v8 = vmul.f32 %v1317_v6, %v3025_v36 }
 0x28e   : > { %1443 = vmatmul.f32.gmra.mxu2 %v1334_v7  ;;  %1484 = vmatmul.f32.gmra.mxu3 %v1335_v8 }
 0x28f   : > { %1525 = vmatmul.f32.gmra.mxu0 %v1334_v7  ;;  %1566 = vmatmul.f32.gmra.mxu1 %v1335_v8 }
 0x2d4   : > { %v1505_v23 = vpop.f32.mrf.mxu0  ;;  %v1546_v10 = vpop.f32.mrf.mxu1 }
 0x2d5   : > { %v1506_v11 = vadd.f32 %v1505_v23, %v3102_v37 }
 0x2d7   : > { %v1547_v13 = vadd.f32 %v1546_v10, %v1506_v11 }
 0x2d9   : > { %v2084_v14 = vmul.f32 -1.442695, %v1547_v13  ;;  %v1423_v15 = vpop.f32.mrf.mxu2  ;;  %v1464_v36 = vpop.f32.mrf.mxu3 }
 0x2da   : > { %v1424_v17 = vadd.f32 %v1423_v15, %v3105_v12 }
 0x2db   : > { %2285 = vpow2.f32 %v2084_v14 }
 0x2dc   : > { %v1465_v38 = vadd.f32 %v1464_v36, %v1424_v17  ;;  %v1508_v18 = vpop.f32.mrf.mxu0  ;;  %v1549_v19 = vpop.f32.mrf.mxu1 }
 0x2dd   : > { %v1509_v20 = vadd.f32 %v1508_v18, %v3102_v37 }
 0x2de   : > { %v2083_v21 = vmul.f32 -1.442695, %v1465_v38 }
 0x2df   : > { %v1550_v22 = vadd.f32 %v1549_v19, %v1509_v20 }
 0x2e0   : > { %2287 = vpow2.f32 %v2083_v21 }
 0x2e1   : > { %v2286_v24 = vpop.eup %2285  ;;  %v2086_v25 = vmul.f32 -1.442695, %v1550_v22  ;;  %v1426_v42 = vpop.f32.mrf.mxu2 }
 0x2e2   : > { %v1467_v26 = vpop.f32.mrf.mxu3  ;;  %v1619_v27 = vadd.f32 1.0, %v2286_v24  ;;  %v1427_v31 = vadd.f32 %v1426_v42, %v3105_v12 }
 0x2e3   : > { %2289 = vpow2.f32 %v2086_v25 }
 0x2e4   : > { %2291 = vrcp.f32 %v1619_v27  ;;  %v1511_v32 = vpop.f32.mrf.mxu0  ;;  %v1552_v33 = vpop.f32.mrf.mxu1  ;;  %v1468_v34 = vadd.f32 %v1467_v26, %v1427_v31  ;;  %v1658_v53 = vand.u32 2147483647, %v1619_v27  ;;  %v1660_v58 = vand.u32 2147483648, %v1619_v27 }
 0x2e5   : > { %v1512_v35 = vadd.f32 %v1511_v32, %v3102_v37  ;;  %vm1654_vm1 = vweird.f32 %v1619_v27 }
 0x2e6   : > { %v2288_v43 = vpop.eup %2287  ;;  %v2085_v41 = vmul.f32 -1.442695, %v1468_v34  ;;  %vm3119_vm2 = vcmp.eq.f32.partialorder %v1658_v53, 8.507059e+37  ;;  %v1661_v46 = vor.u32 1.1754944e-38, %v1660_v58 }
 0x2e7   : > { %v3111_v40 = vadd.f32 1.0, %v2288_v43  ;;  %v1553_v44 = vadd.f32 %v1552_v33, %v1512_v35 }
 0x2e9   : > { %v2290_v47 = vpop.eup %2289  ;;  %2293 = vrcp.f32 %v3111_v40  ;;  %v1429_v39 = vpop.f32.mrf.mxu2  ;;  %v2088_v51 = vmul.f32 -1.442695, %v1553_v44  ;;  %vm1639_vm4 = vweird.f32 %v3111_v40  ;;  %v1645_v9 = vand.u32 2147483648, %v3111_v40 }
 0x2ea   : > { %v1470_v48 = vpop.f32.mrf.mxu3  ;;  %v2292_v45 = vpop.eup %2291  ;;  %v3114_v49 = vadd.f32 1.0, %v2290_v47  ;;  %2295 = vpow2.f32 %v2085_v41  ;;  %v1430_v52 = vadd.f32 %v1429_v39, %v3105_v12  ;;  %v1643_v13 = vand.u32 2147483647, %v3111_v40 }
 0x2eb   : > { %v1650_v50 = vmul.f32 %v2292_v45, %v1619_v27  ;;  %vm1655_vm0 = vweird.f32 %v2292_v45  ;;  %v1646_v24 = vor.u32 1.1754944e-38, %v1645_v9 }
 0x2ec   : > { %2297 = vrcp.f32 %v3114_v49  ;;  %v1514_v54 = vpop.f32.mrf.mxu0  ;;  %v1555_v57 = vpop.f32.mrf.mxu1  ;;  %v1471_v56 = vadd.f32 %v1470_v48, %v1430_v52  ;;  %vm1656_vm3 = vmor %vm1654_vm1, %vm1655_vm0  ;;  %v1688_v17 = vand.u32 2147483647, %v3114_v49  ;;  %v1690_v19 = vand.u32 2147483648, %v3114_v49 }
 0x2ed   : > { %v1651_v55 = vsub.f32 1.0, %v1650_v50  ;;  %2299 = vpow2.f32 %v2088_v51  ;;  %v1515_v28 = vadd.f32 %v1514_v54, %v3102_v37  ;;  %vm1644_vm8 = vcmp.eq.f32.partialorder %v1643_v13, 8.507059e+37 }
 0x2ee   : > { %v2087_v60 = vmul.f32 -1.442695, %v1471_v56  ;;  %vm1684_vm9 = vweird.f32 %v3114_v49  ;;  %vm1689_vm11 = vcmp.eq.f32.partialorder %v1688_v17, 8.507059e+37  ;;  %v1691_v43 = vor.u32 1.1754944e-38, %v1690_v19 }
 0x2ef   : > { %v2294_v59 = vpop.eup %2293  ;;  %v1652_v4 = vmul.f32 %v2292_v45, %v1651_v55  ;;  %v1556_v0 = vadd.f32 %v1555_v57, %v1515_v28 }
 0x2f0   : > { %v2296_v61 = vpop.eup %2295  ;;  %v1635_v29 = vmul.f32 %v2294_v59, %v3111_v40  ;;  %2301 = vpow2.f32 %v2087_v60  ;;  %vm1640_vm5 = vweird.f32 %v2294_v59 }
 0x2f1   : > { %v1653_v62 = vadd.f32 %v2292_v45, %v1652_v4  ;;  %v3124_v63 = vadd.f32 1.0, %v2296_v61  ;;  %v2090_v30 = vmul.f32 -1.442695, %v1556_v0  ;;  %v1432_v1 = vpop.f32.mrf.mxu2  ;;  %vm1641_vm6 = vmor %vm1639_vm4, %vm1640_vm5 }
 0x2f2   : > { %v1473_v2 = vpop.f32.mrf.mxu3  ;;  %v2298_v3 = vpop.eup %2297  ;;  %v1636_v5 = vsub.f32 1.0, %v1635_v29  ;;  %v1433_v6 = vadd.f32 %v1432_v1, %v3105_v12 }
 0x2f3   : > { %v2300_v7 = vpop.eup %2299  ;;  %v1657_v8 = vsel %vm1656_vm3, %v2292_v45, %v1653_v62  ;;  %v1680_v23 = vmul.f32 %v2298_v3, %v3114_v49  ;;  %2303 = vrcp.f32 %v3124_v63  ;;  %vm1685_vm7 = vweird.f32 %v2298_v3 }
 0x2f4   : > { %v1662_v10 = vsel %vm3119_vm2, %v1661_v46, %v1657_v8  ;;  %v1637_v11 = vmul.f32 %v2294_v59, %v1636_v5  ;;  %v1517_v14 = vpop.f32.mrf.mxu0  ;;  %v1558_v15 = vpop.f32.mrf.mxu1  ;;  %v3139_v38 = vadd.f32 1.0, %v2300_v7  ;;  %2305 = vpow2.f32 %v2090_v30  ;;  %vm1686_vm10 = vmor %vm1684_vm9, %vm1685_vm7 }
 0x2f5   : > { %1875 = vst [vmem:[%s3135_s22 + $0x8] sm:$0xff] %v1662_v10  ;;  %v1681_v36 = vsub.f32 1.0, %v1680_v23  ;;  %v1474_v20 = vadd.f32 %v1473_v2, %v1433_v6  ;;  %v1518_v21 = vadd.f32 %v1517_v14, %v3102_v37  ;;  %v1673_v41 = vand.u32 2147483647, %v3124_v63 }
 0x2f6   : > { %v1638_v18 = vadd.f32 %v2294_v59, %v1637_v11  ;;  %v2302_v22 = vpop.eup %2301  ;;  %2307 = vrcp.f32 %v3139_v38  ;;  %v1675_v48 = vand.u32 2147483648, %v3124_v63  ;;  %v1718_v45 = vand.u32 2147483647, %v3139_v38 }
 0x2f7   : > { %v1682_v25 = vmul.f32 %v2298_v3, %v1681_v36  ;;  %v3148_v26 = vadd.f32 1.0, %v2302_v22  ;;  %v2089_v33 = vmul.f32 -1.442695, %v1474_v20  ;;  %v1559_v34 = vadd.f32 %v1558_v15, %v1518_v21 }
 0x2f8   : > { %v1642_v42 = vsel %vm1641_vm6, %v2294_v59, %v1638_v18  ;;  %vm1669_vm12 = vweird.f32 %v3124_v63  ;;  %v1720_v54 = vand.u32 2147483648, %v3139_v38  ;;  %vm3162_vm14 = vcmp.eq.f32.partialorder %v1673_v41, 8.507059e+37 }
 0x2f9   : > { %v2304_v27 = vpop.eup %2303  ;;  %v1647_v31 = vsel %vm1644_vm8, %v1646_v24, %v1642_v42  ;;  %v1683_v32 = vadd.f32 %v2298_v3, %v1682_v25  ;;  %v1435_v35 = vpop.f32.mrf.mxu2  ;;  %2309 = vrcp.f32 %v3148_v26  ;;  %v2092_v57 = vmul.f32 -1.442695, %v1559_v34 }
 0x2fa   : > { %1874 = vst [vmem:[%s3135_s22] sm:$0xff] %v1647_v31  ;;  %v1665_v40 = vmul.f32 %v2304_v27, %v3124_v63  ;;  %v1476_v44 = vpop.f32.mrf.mxu3  ;;  %v2306_v47 = vpop.eup %2305  ;;  %2311 = vpow2.f32 %v2089_v33  ;;  %v1436_v55 = vadd.f32 %v1435_v35, %v3105_v12  ;;  %vm1670_vm13 = vweird.f32 %v2304_v27 }
 0x2fb   : > { %v1687_v39 = vsel %vm1686_vm10, %v2298_v3, %v1683_v32  ;;  %v3157_v52 = vadd.f32 1.0, %v2306_v47  ;;  %v1676_v4 = vor.u32 1.1754944e-38, %v1675_v48  ;;  %vm1714_vm15 = vweird.f32 %v3139_v38  ;;  %vm1671_vm1 = vmor %vm1669_vm12, %vm1670_vm13 }
 0x2fc   : > { %v1692_v49 = vsel %vm1689_vm11, %v1691_v43, %v1687_v39  ;;  %v1666_v51 = vsub.f32 1.0, %v1665_v40  ;;  %v1520_v50 = vpop.f32.mrf.mxu0  ;;  %v2308_v53 = vpop.eup %2307  ;;  %vm3168_vm0 = vcmp.eq.f32.partialorder %v1718_v45, 8.507059e+37  ;;  %v1477_v16 = vadd.f32 %v1476_v44, %v1436_v55 }
 0x2fd   : > { %1877 = vst [vmem:[%s3135_s22 + $0x18] sm:$0xff] %v1692_v49  ;;  %v1710_v58 = vmul.f32 %v2308_v53, %v3139_v38  ;;  %v1561_v59 = vpop.f32.mrf.mxu1  ;;  %2313 = vrcp.f32 %v3157_v52  ;;  %v1721_v62 = vor.u32 1.1754944e-38, %v1720_v54  ;;  %v1703_v30 = vand.u32 2147483647, %v3148_v26 }
 0x2fe   : > { %v1667_v56 = vmul.f32 %v2304_v27, %v1666_v51  ;;  %2315 = vpow2.f32 %v2092_v57  ;;  %v1705_v1 = vand.u32 2147483648, %v3148_v26  ;;  %v1521_v2 = vadd.f32 %v1520_v50, %v3102_v37 }
 0x2ff   : > { %v1711_v61 = vsub.f32 1.0, %v1710_v58  ;;  %v2310_v29 = vpop.eup %2309  ;;  %vm1715_vm2 = vweird.f32 %v2308_v53  ;;  %v2091_v63 = vmul.f32 -1.442695, %v1477_v16  ;;  %vm1699_vm3 = vweird.f32 %v3148_v26 }
 0x300   : > { %v1668_v0 = vadd.f32 %v2304_v27, %v1667_v56  ;;  %v1695_v6 = vmul.f32 %v2310_v29, %v3148_v26  ;;  %v2312_v7 = vpop.eup %2311  ;;  %v1562_v9 = vadd.f32 %v1561_v59, %v1521_v2  ;;  %vm1716_vm4 = vmor %vm1714_vm15, %vm1715_vm2  ;;  %vm1700_vm5 = vweird.f32 %v2310_v29 }
 0x301   : > { %v1438_v3 = vpop.f32.mrf.mxu2  ;;  %v1712_v5 = vmul.f32 %v2308_v53, %v1711_v61  ;;  %v3184_v13 = vadd.f32 1.0, %v2312_v7  ;;  %2317 = vpow2.f32 %v2091_v63  ;;  %vm3193_vm6 = vcmp.eq.f32.partialorder %v1703_v30, 8.507059e+37  ;;  %vm1701_vm7 = vmor %vm1699_vm3, %vm1700_vm5 }
 0x302   : > { %v1672_v46 = vsel %vm1671_vm1, %v2304_v27, %v1668_v0  ;;  %v1439_v23 = vadd.f32 %v1438_v3, %v3105_v12  ;;  %v1696_v11 = vsub.f32 1.0, %v1695_v6  ;;  %v1479_v14 = vpop.f32.mrf.mxu3  ;;  %v2094_v17 = vmul.f32 -1.442695, %v1562_v9 }
 0x303   : > { %v1677_v8 = vsel %vm3162_vm14, %v1676_v4, %v1672_v46  ;;  %v1713_v10 = vadd.f32 %v2308_v53, %v1712_v5  ;;  %v2314_v36 = vpop.eup %2313  ;;  %v1706_v38 = vor.u32 1.1754944e-38, %v1705_v1  ;;  %2319 = vrcp.f32 %v3184_v13 }
 0x304   : > { %1876 = vst [vmem:[%s3135_s22 + $0x10] sm:$0xff] %v1677_v8  ;;  %v1523_v15 = vpop.f32.mrf.mxu0  ;;  %v1480_v18 = vadd.f32 %v1479_v14, %v1439_v23  ;;  %v2316_v20 = vpop.eup %2315  ;;  %v1697_v22 = vmul.f32 %v2310_v29, %v1696_v11  ;;  %v1740_v24 = vmul.f32 %v2314_v36, %v3157_v52  ;;  %v1748_v32 = vand.u32 2147483647, %v3157_v52 }
 0x305   : > { %v1524_v19 = vadd.f32 %v1523_v15, %v3102_v37  ;;  %v1717_v21 = vsel %vm1716_vm4, %v2308_v53, %v1713_v10  ;;  %v3200_v33 = vadd.f32 1.0, %v2316_v20  ;;  %v1564_v34 = vpop.f32.mrf.mxu1  ;;  %v1750_v35 = vand.u32 2147483648, %v3157_v52 }
 0x306   : > { %v1722_v25 = vsel %vm3168_vm0, %v1721_v62, %v1717_v21  ;;  %v1698_v27 = vadd.f32 %v2310_v29, %v1697_v22  ;;  %v1741_v31 = vsub.f32 1.0, %v1740_v24  ;;  %2321 = vpow2.f32 %v2094_v17 }
 0x307   : > { %1879 = vst [vmem:[%s3135_s22 + $0x28] sm:$0xff] %v1722_v25  ;;  %v2093_v43 = vmul.f32 -1.442695, %v1480_v18  ;;  %v1565_v40 = vadd.f32 %v1564_v34, %v1524_v19  ;;  %vm1745_vm8 = vweird.f32 %v2314_v36  ;;  %2323 = vrcp.f32 %v3200_v33  ;;  %v2318_v39 = vpop.eup %2317 }
 0x308   : > { %v1702_v41 = vsel %vm1701_vm7, %v2310_v29, %v1698_v27  ;;  %v1742_v44 = vmul.f32 %v2314_v36, %v1741_v31  ;;  %vm1744_vm9 = vweird.f32 %v3157_v52  ;;  %v3210_v45 = vadd.f32 1.0, %v2318_v39 }
 0x309   : > { %v1441_v47 = vpop.f32.mrf.mxu2  ;;  %v1707_v48 = vsel %vm3193_vm6, %v1706_v38, %v1702_v41  ;;  %2325 = vpow2.f32 %v2093_v43  ;;  %v2096_v49 = vmul.f32 -1.442695, %v1565_v40  ;;  %v2320_v50 = vpop.eup %2319  ;;  %vm1746_vm10 = vmor %vm1744_vm9, %vm1745_vm8  ;;  %v1751_v53 = vor.u32 1.1754944e-38, %v1750_v35 }
 0x30a   : > { %1878 = vst [vmem:[%s3135_s22 + $0x20] sm:$0xff] %v1707_v48  ;;  %v1743_v26 = vadd.f32 %v2314_v36, %v1742_v44  ;;  %v1442_v54 = vadd.f32 %v1441_v47, %v3105_v12  ;;  %vm1749_vm11 = vcmp.eq.f32.partialorder %v1748_v32, 8.507059e+37  ;;  %v1725_v55 = vmul.f32 %v2320_v50, %v3184_v13  ;;  %v1482_v59 = vpop.f32.mrf.mxu3 }
 0x30b   : > { %2327 = vrcp.f32 %v3210_v45  ;;  %v1733_v28 = vand.u32 2147483647, %v3184_v13  ;;  %v1735_v58 = vand.u32 2147483648, %v3184_v13  ;;  %vm1729_vm12 = vweird.f32 %v3184_v13 }
 0x30c   : > { %v1526_v51 = vpop.f32.mrf.mxu0  ;;  %v1747_v57 = vsel %vm1746_vm10, %v2314_v36, %v1743_v26  ;;  %v2322_v52 = vpop.eup %2321  ;;  %v1726_v0 = vsub.f32 1.0, %v1725_v55  ;;  %2329 = vpow2.f32 %v2096_v49  ;;  %v1483_v16 = vadd.f32 %v1482_v59, %v1442_v54 }
 0x30d   : > { %v1752_v56 = vsel %vm1749_vm11, %v1751_v53, %v1747_v57  ;;  %v1527_v4 = vadd.f32 %v1526_v51, %v3102_v37  ;;  %v2324_v60 = vpop.eup %2323  ;;  %v3219_v61 = vadd.f32 1.0, %v2322_v52  ;;  %v1778_v62 = vand.u32 2147483647, %v3200_v33  ;;  %v1567_v6 = vpop.f32.mrf.mxu1 }
 0x30e   : > { %1881 = vst [vmem:[%s3135_s22 + $0x38] sm:$0xff] %v1752_v56  ;;  %v1770_v29 = vmul.f32 %v2324_v60, %v3200_v33  ;;  %v1727_v1 = vmul.f32 %v2320_v50, %v1726_v0  ;;  %vm1730_vm13 = vweird.f32 %v2320_v50  ;;  %v1780_v2 = vand.u32 2147483648, %v3200_v33 }
 0x30f   : > { %v2326_v30 = vpop.eup %2325  ;;  %2331 = vrcp.f32 %v3219_v61  ;;  %vm3226_vm14 = vcmp.eq.f32.partialorder %v1733_v28, 8.507059e+37  ;;  %v1736_v3 = vor.u32 1.1754944e-38, %v1735_v58  ;;  %vm1774_vm15 = vweird.f32 %v3200_v33  ;;  %vm1731_vm0 = vmor %vm1729_vm12, %vm1730_vm13 }
 0x310   : > { %v1771_v46 = vsub.f32 1.0, %v1770_v29  ;;  %v3230_v5 = vadd.f32 1.0, %v2326_v30  ;;  %v1728_v8 = vadd.f32 %v2320_v50, %v1727_v1  ;;  %v2095_v63 = vmul.f32 -1.442695, %v1483_v16 }
 0x311   : > { %v2328_v7 = vpop.eup %2327  ;;  %v1568_v9 = vadd.f32 %v1567_v6, %v1527_v4  ;;  %vm1775_vm1 = vweird.f32 %v2324_v60  ;;  %vm3235_vm2 = vcmp.eq.f32.partialorder %v1778_v62, 8.507059e+37  ;;  %v1444_v14 = vpop.f32.mrf.mxu2  ;;  %v1781_v17 = vor.u32 1.1754944e-38, %v1780_v2 }
 0x312   : > { %v1772_v23 = vmul.f32 %v2324_v60, %v1771_v46  ;;  %v1755_v11 = vmul.f32 %v2328_v7, %v3210_v45  ;;  %v2330_v15 = vpop.eup %2329  ;;  %v1732_v36 = vsel %vm1731_vm0, %v2320_v50, %v1728_v8  ;;  %v1763_v18 = vand.u32 2147483647, %v3210_v45  ;;  %vm1776_vm3 = vmor %vm1774_vm15, %vm1775_vm1 }
 0x313   : > { %2333 = vrcp.f32 %v3230_v5  ;;  %v1737_v13 = vsel %vm3226_vm14, %v1736_v3, %v1732_v36  ;;  %v1765_v21 = vand.u32 2147483648, %v3210_v45  ;;  %v3249_v24 = vadd.f32 1.0, %v2330_v15 }
 0x314   : > { %v1773_v19 = vadd.f32 %v2324_v60, %v1772_v23  ;;  %v1756_v20 = vsub.f32 1.0, %v1755_v11  ;;  %1880 = vst [vmem:[%s3135_s22 + $0x30] sm:$0xff] %v1737_v13  ;;  %2335 = vpow2.f32 %v2095_v63  ;;  %v2098_v25 = vmul.f32 -1.442695, %v1568_v9 }
 0x315   : > { %v2332_v22 = vpop.eup %2331  ;;  %v1445_v42 = vadd.f32 %v1444_v14, %v3105_v12  ;;  %vm1760_vm4 = vweird.f32 %v2328_v7  ;;  %vm1759_vm5 = vweird.f32 %v3210_v45  ;;  %2337 = vrcp.f32 %v3249_v24  ;;  %v1485_v12 = vpop.f32.mrf.mxu3 }
 0x316   : > { %v1777_v38 = vsel %vm1776_vm3, %v2324_v60, %v1773_v19  ;;  %v1757_v27 = vmul.f32 %v2328_v7, %v1756_v20  ;;  %v1800_v31 = vmul.f32 %v2332_v22, %v3219_v61  ;;  %vm1764_vm6 = vcmp.eq.f32.partialorder %v1763_v18, 8.507059e+37  ;;  %vm1761_vm7 = vmor %vm1759_vm5, %vm1760_vm4 }
 0x317   : > { %v1782_v32 = vsel %vm3235_vm2, %v1781_v17, %v1777_v38  ;;  %v1808_v35 = vand.u32 2147483647, %v3219_v61  ;;  %v1766_v40 = vor.u32 1.1754944e-38, %v1765_v21  ;;  %v1810_v41 = vand.u32 2147483648, %v3219_v61 }
 0x318   : > { %1883 = vst [vmem:[%s3135_s22 + $0x48] sm:$0xff] %v1782_v32  ;;  %v1758_v33 = vadd.f32 %v2328_v7, %v1757_v27  ;;  %v1801_v34 = vsub.f32 1.0, %v1800_v31  ;;  %2339 = vpow2.f32 %v2098_v25  ;;  %v1486_v44 = vadd.f32 %v1485_v12, %v1445_v42 }
 0x319   : > { %v2334_v43 = vpop.eup %2333  ;;  %vm1805_vm8 = vweird.f32 %v2332_v22  ;;  %vm1804_vm9 = vweird.f32 %v3219_v61  ;;  %vm1809_vm10 = vcmp.eq.f32.partialorder %v1808_v35, 8.507059e+37  ;;  %v1811_v57 = vor.u32 1.1754944e-38, %v1810_v41 }
 0x31a   : > { %v1762_v47 = vsel %vm1761_vm7, %v2328_v7, %v1758_v33  ;;  %v1802_v39 = vmul.f32 %v2332_v22, %v1801_v34  ;;  %v1785_v48 = vmul.f32 %v2334_v43, %v3230_v5  ;;  %v2336_v26 = vpop.eup %2335  ;;  %v2097_v49 = vmul.f32 -1.442695, %v1486_v44  ;;  %vm1806_vm11 = vmor %vm1804_vm9, %vm1805_vm8 }
 0x31b   : > { %v1767_v45 = vsel %vm1764_vm6, %v1766_v40, %v1762_v47  ;;  %v3263_v53 = vadd.f32 1.0, %v2336_v26  ;;  %v2338_v54 = vpop.eup %2337  ;;  %v1793_v55 = vand.u32 2147483647, %v3230_v5  ;;  %v1795_v52 = vand.u32 2147483648, %v3230_v5 }
 0x31c   : > { %1882 = vst [vmem:[%s3135_s22 + $0x40] sm:$0xff] %v1767_v45  ;;  %v1803_v51 = vadd.f32 %v2332_v22, %v1802_v39  ;;  %v1786_v50 = vsub.f32 1.0, %v1785_v48  ;;  %2341 = vpow2.f32 %v2097_v49  ;;  %vm1790_vm12 = vweird.f32 %v2334_v43 }
 0x31d   : > { %v1830_v58 = vmul.f32 %v2338_v54, %v3249_v24  ;;  %2343 = vrcp.f32 %v3263_v53  ;;  %vm1789_vm13 = vweird.f32 %v3230_v5  ;;  %vm1794_vm15 = vcmp.eq.f32.partialorder %v1793_v55, 8.507059e+37 }
 0x31e   : > { %v1807_v56 = vsel %vm1806_vm11, %v2332_v22, %v1803_v51  ;;  %v1787_v28 = vmul.f32 %v2334_v43, %v1786_v50  ;;  %v2340_v59 = vpop.eup %2339  ;;  %vm1791_vm14 = vmor %vm1789_vm13, %vm1790_vm12  ;;  %v1796_v16 = vor.u32 1.1754944e-38, %v1795_v52  ;;  %v1838_v29 = vand.u32 2147483647, %v3249_v24 }
 0x31f   : > { %v1812_v4 = vsel %vm1809_vm10, %v1811_v57, %v1807_v56  ;;  %v1831_v0 = vsub.f32 1.0, %v1830_v58  ;;  %v1633_v61 = vadd.f32 1.0, %v2340_v59  ;;  %v1840_v62 = vand.u32 2147483648, %v3249_v24 }
 0x320   : > { %1885 = vst [vmem:[%s3135_s22 + $0x58] sm:$0xff] %v1812_v4  ;;  %v1788_v60 = vadd.f32 %v2334_v43, %v1787_v28  ;;  %vm1835_vm0 = vweird.f32 %v2338_v54  ;;  %vm1834_vm1 = vweird.f32 %v3249_v24  ;;  %vm1839_vm3 = vcmp.eq.f32.partialorder %v1838_v29, 8.507059e+37 }
 0x321   : > { %v1832_v1 = vmul.f32 %v2338_v54, %v1831_v0  ;;  %2345 = vrcp.f32 %v1633_v61  ;;  %vm1836_vm2 = vmor %vm1834_vm1, %vm1835_vm0  ;;  %v1841_v6 = vor.u32 1.1754944e-38, %v1840_v62  ;;  %v1825_v10 = vand.u32 2147483648, %v3263_v53 }
 0x322   : > { %v1792_v30 = vsel %vm1791_vm14, %v2334_v43, %v1788_v60  ;;  %v2342_v2 = vpop.eup %2341  ;;  %v1823_v15 = vand.u32 2147483647, %v3263_v53  ;;  %vm1819_vm5 = vweird.f32 %v3263_v53  ;;  %v1868_v13 = vand.u32 2147483647, %v1633_v61 }
 0x323   : > { %v1797_v37 = vsel %vm1794_vm15, %v1796_v16, %v1792_v30  ;;  %v1833_v3 = vadd.f32 %v2338_v54, %v1832_v1  ;;  %v1632_v46 = vadd.f32 1.0, %v2342_v2  ;;  %v2344_v5 = vpop.eup %2343  ;;  %v1870_v19 = vand.u32 2147483648, %v1633_v61 }
 0x324   : > { %1884 = vst [vmem:[%s3135_s22 + $0x50] sm:$0xff] %v1797_v37  ;;  %v1815_v8 = vmul.f32 %v2344_v5, %v3263_v53  ;;  %vm1820_vm4 = vweird.f32 %v2344_v5  ;;  %v1826_v20 = vor.u32 1.1754944e-38, %v1825_v10  ;;  %vm1824_vm8 = vcmp.eq.f32.partialorder %v1823_v15, 8.507059e+37 }
 0x325   : > { %v1837_v7 = vsel %vm1836_vm2, %v2338_v54, %v1833_v3  ;;  %2347 = vrcp.f32 %v1632_v46  ;;  %vm1821_vm6 = vmor %vm1819_vm5, %vm1820_vm4  ;;  %vm1864_vm9 = vweird.f32 %v1633_v61  ;;  %vm1869_vm11 = vcmp.eq.f32.partialorder %v1868_v13, 8.507059e+37 }
 0x326   : > { %v1842_v63 = vsel %vm1839_vm3, %v1841_v6, %v1837_v7  ;;  %v1816_v23 = vsub.f32 1.0, %v1815_v8  ;;  %v1871_v27 = vor.u32 1.1754944e-38, %v1870_v19  ;;  %v1855_v31 = vand.u32 2147483648, %v1632_v46 }
 0x327   : > { %v2346_v9 = vpop.eup %2345  ;;  %1887 = vst [vmem:[%s3135_s22 + $0x68] sm:$0xff] %v1842_v63  ;;  %v1853_v34 = vand.u32 2147483647, %v1632_v46  ;;  %vm1849_vm13 = vweird.f32 %v1632_v46 }
 0x328   : > { %v1860_v11 = vmul.f32 %v2346_v9, %v1633_v61  ;;  %v1817_v14 = vmul.f32 %v2344_v5, %v1816_v23  ;;  %vm1865_vm7 = vweird.f32 %v2346_v9  ;;  %v1856_v43 = vor.u32 1.1754944e-38, %v1855_v31 }
 0x329   : > { %vm1866_vm10 = vmor %vm1864_vm9, %vm1865_vm7  ;;  %vm1854_vm15 = vcmp.eq.f32.partialorder %v1853_v34, 8.507059e+37 }
 0x32a   : > { %v1861_v36 = vsub.f32 1.0, %v1860_v11  ;;  %v1818_v18 = vadd.f32 %v2344_v5, %v1817_v14 }
 0x32b   : > { %v2348_v17 = vpop.eup %2347 }
 0x32c   : > { %v1862_v21 = vmul.f32 %v2346_v9, %v1861_v36  ;;  %v1845_v22 = vmul.f32 %v2348_v17, %v1632_v46  ;;  %v1822_v24 = vsel %vm1821_vm6, %v2344_v5, %v1818_v18  ;;  %vm1850_vm12 = vweird.f32 %v2348_v17 }
 0x32d   : > { %v1827_v25 = vsel %vm1824_vm8, %v1826_v20, %v1822_v24  ;;  %vm1851_vm14 = vmor %vm1849_vm13, %vm1850_vm12 }
 0x32e   : > { %v1863_v42 = vadd.f32 %v2346_v9, %v1862_v21  ;;  %v1846_v38 = vsub.f32 1.0, %v1845_v22  ;;  %1886 = vst [vmem:[%s3135_s22 + $0x60] sm:$0xff] %v1827_v25 }
 0x330   : > { %v1867_v32 = vsel %vm1866_vm10, %v2346_v9, %v1863_v42  ;;  %v1847_v33 = vmul.f32 %v2348_v17, %v1846_v38 }
 0x331   : > { %v1872_v35 = vsel %vm1869_vm11, %v1871_v27, %v1867_v32 }
 0x332   : > { %1889 = vst [vmem:[%s3135_s22 + $0x78] sm:$0xff] %v1872_v35  ;;  %v1848_v12 = vadd.f32 %v2348_v17, %v1847_v33 }
 0x334   : > { %v1852_v40 = vsel %vm1851_vm14, %v2348_v17, %v1848_v12 }
 0x335   : > { %v1857_v41 = vsel %vm1854_vm15, %v1856_v43, %v1852_v40 }
 0x336   : > { %1888 = vst [vmem:[%s3135_s22 + $0x70] sm:$0xff] %v1857_v41 }
 0x337   : > { %2586 = shalt.err (!%p2583_p5)
}
 0x338   : > { %s2652_s4 = smov 256   ;;  %s2653_s14 = smov 16  }
 0x339   : > { %2167 = dma.vmem_to_hbm [thread:$0]  (%p2813_p0), %s1905_s24, 2048, %s1907_s21, %s1891_s30, %s2652_s4, %s2652_s4, %s2653_s14  }
 0x33a PF: > { %s1921_s12 = sand.u32 1, %s2629_s17   ;;  %p3372_p10 = scmp.ge.s32.totalorder %s2641_s20, 2 }
 0x33b   : > { %s1922_s5 = scalar_lea.sflag [#allocation4], %s1921_s12 }
 0x33c   : > { %p2193_p11 = pnand %p3372_p10, %p2819_p6 }
 0x33e   : > { %p2194_p12 = pneg %p2193_p11 }
 0x340   : > { %2624 = dma.done.wait (%p2194_p12), %s1922_s5, 2048  }
 0x341   : > { %2626 = vsyncadd (%p2194_p12), %s1922_s5, 4294965248  ;;  %s3373_s20 = sld [smem:[#allocation22_spill]]  ;;  %s3376_s17 = smov %s2633_s18 }
 0x342   : > { %s3374_s26 = sld [smem:[#allocation21_spill]] }
 0x343   : > { %s3375_s19 = sld [smem:[#allocation23_spill]] }
 0x347   : > { %p29_p2 = scmp.ge.s32.totalorder %s3373_s20, 4  }
 0x348   : > { %s3377_s18 = smov %s3374_s26 }
 0x349   :  { %31 = sbr.rel (!%p29_p2) target bundleno = 16 (0x10), region = 142 }
 0x34e   :  { %1928 = vsyncpa [#allocation3], 1 }
 0x34f   :  { %1930 = vsyncpa [#allocation3 + $0x1], 1 }
 0x350   :  { %1931 = vsyncpa [#allocation6], 1 }
 0x351   :  { %1933 = vsyncpa [#allocation6 + $0x1], 1 }
 0x352   :  { %1934 = vsyncpa [#allocation9], 1 }
 0x353   :  { %1935 = vsyncpa [#allocation12], 1 }
 0x354   :  { %1936 = vsyncpa [#allocation4], 1 }
 0x355   :  { %1938 = vsyncpa [#allocation4 + $0x1], 1 }

</bundles_post_ra>
